<compile_context>
chip_gen: v6e
topology: v6e:2x2x1
jax: 0.10.0
libtpu: 0.0.40
codegen_flags: <defaults>
</compile_context>

<pallas_src>
import functools
import math

import jax
import jax.numpy as jnp
from jax.experimental import pallas as pl
from jax.experimental.pallas import tpu as pltpu

LN_EPS = 1e-5


# ------------------------------ small helpers ------------------------------

def _ln_f32(x, g, b):
    """LayerNorm over the last axis, f32 statistics."""
    m = jnp.mean(x, axis=-1, keepdims=True)
    v = jnp.mean((x - m) ** 2, axis=-1, keepdims=True)
    return (x - m) * jax.lax.rsqrt(v + LN_EPS) * g + b


def _erf_poly(x):
    # Abramowitz-Stegun 7.1.26 polynomial (|err| < 1.5e-7): exact-GELU semantics
    # using only exp (EUP) inside the kernel.
    a1, a2, a3, a4, a5 = 0.254829592, -0.284496736, 1.421413741, -1.453152027, 1.061405429
    p = 0.3275911
    ax = jnp.abs(x)
    t = 1.0 / (1.0 + p * ax)
    y = 1.0 - (((((a5 * t + a4) * t) + a3) * t + a2) * t + a1) * t * jnp.exp(-ax * ax)
    return jnp.where(x >= 0, y, -y)


def _gelu(x):
    return 0.5 * x * (1.0 + _erf_poly(x * (1.0 / math.sqrt(2.0))))


def _softmax_rows(s):
    s = s - jnp.max(s, axis=-1, keepdims=True)
    p = jnp.exp(s)
    return p * pl.reciprocal(jnp.sum(p, axis=-1, keepdims=True), approx=True)


def _bcast(shape):
    # Grid-invariant operand: whole array as one block, loaded once.
    zeros = (0,) * len(shape)
    return pl.BlockSpec(shape, lambda b, _z=zeros: _z)


# --------------------------- fused decoder-layer kernel ----------------------
# LN1 -> cross-attention (Q proj + fused KV proj + per-head softmax + out proj)
# -> LayerScale1 + residual -> LN2 -> GAT (dense adjacency built in-kernel) +
# edge linear update -> LayerScale2 + residual -> LN3(pre_gat) -> FFN ->
# LayerScale3 + residual (on post_gat, matching the reference's quirk).

def _decoder_layer_kernel(x_ref, f_ref, m_ref, embn_ref, embe_ref, ei_ref,
                          g1_ref, b1_ref, wq_ref, bq_ref, wkv_ref, bkv_ref,
                          wo_ref, bo_ref, ls1_ref, g2_ref, b2_ref,
                          gw_ref, asrc_ref, adst_ref, gb_ref, wedge_ref,
                          bedge_ref, ls2_ref,
                          g3_ref, b3_ref, w1_ref, fb1_ref, w2_ref, fb2_ref,
                          ls3_ref,
                          on_ref, oe_ref, *, num_heads, n_nodes):
    N = n_nodes

    # ---------------- 1) cross-attention block ----------------
    x = x_ref[0].astype(jnp.float32)                      # [L, D] pre-LN queries
    xn = _ln_f32(x, g1_ref[...], b1_ref[...])             # [L, D]

    q = jnp.dot(xn, wq_ref[...], preferred_element_type=jnp.float32) + bq_ref[...]
    kv = jnp.dot(f_ref[0], wkv_ref[...], preferred_element_type=jnp.float32) + bkv_ref[...]

    D = q.shape[-1]
    k = kv[:, :D]                                         # [HW, D]
    v = kv[:, D:]                                         # [HW, D]
    mask = m_ref[0].astype(jnp.float32)                   # [H, L, HW] additive mask
    Dh = D // num_heads
    scale = 1.0 / math.sqrt(Dh)

    ctx_heads = []
    for h in range(num_heads):                            # static unroll, H small
        qh = q[:, h * Dh:(h + 1) * Dh] * scale
        kh = k[:, h * Dh:(h + 1) * Dh]
        vh = v[:, h * Dh:(h + 1) * Dh]
        # contract last axes of q and k -> no materialized transpose of k
        s = jax.lax.dot_general(qh, kh, (((1,), (1,)), ((), ())),
                                preferred_element_type=jnp.float32)
        s = s + mask[h]
        p = _softmax_rows(s)
        ctx_heads.append(jnp.dot(p, vh, preferred_element_type=jnp.float32))
    ctx = jnp.concatenate(ctx_heads, axis=-1)             # [L, D] lane-dense

    attn = jnp.dot(ctx, wo_ref[...], preferred_element_type=jnp.float32) + bo_ref[...]
    post_cross = x + ls1_ref[...] * attn                  # LayerScale1 + residual
    pre_gat = _ln_f32(post_cross, g2_ref[...], b2_ref[...])  # [L, D]

    # ---------------- 2) GAT block ----------------
    # TODO(synk): project-specific gnn.GATConv(graphs, embeddings) source is not
    # available; approximated as standard multi-head GAT over nodes (self-loops,
    # embeddings added DETR-style) plus a linear update for edge features.
    nodes_ln = pre_gat[:N, :]                             # [N, D]
    edges_ln = pre_gat[N:, :]                             # [E, D]

    hproj = jnp.dot(nodes_ln + embn_ref[0].astype(jnp.float32), gw_ref[...],
                    preferred_element_type=jnp.float32)   # [N, D] projected nodes

    # Dense adjacency built in-kernel from edge_index (no HBM scatter):
    # adj[dst, src] >= 1 iff edge exists; self-loops added via identity.
    ei = ei_ref[0]                                        # [2, E] int32 (row0=src, row1=dst)
    Eedges = ei.shape[1]
    src = ei[0:1, :]
    dst = ei[1:2, :]
    row_iota = jax.lax.broadcasted_iota(jnp.int32, (N, Eedges), 0)
    onehot_src = (row_iota == src).astype(jnp.float32)    # [N, E]
    onehot_dst = (row_iota == dst).astype(jnp.float32)    # [N, E]
    adj = jax.lax.dot_general(onehot_dst, onehot_src, (((1,), (1,)), ((), ())),
                              preferred_element_type=jnp.float32)     # [N, N]
    eye = (jax.lax.broadcasted_iota(jnp.int32, (N, N), 0) ==
           jax.lax.broadcasted_iota(jnp.int32, (N, N), 1)).astype(jnp.float32)
    adj = adj + eye

    out_heads = []
    for hd in range(num_heads):                           # static unroll
        hh = hproj[:, hd * Dh:(hd + 1) * Dh]              # [N, Dh]
        a_s = asrc_ref[hd:hd + 1, :].astype(jnp.float32)  # [1, Dh]
        a_d = adst_ref[hd:hd + 1, :].astype(jnp.float32)  # [1, Dh]
        alpha_src = jax.lax.dot_general(a_s, hh, (((1,), (1,)), ((), ())),
                                        preferred_element_type=jnp.float32)  # [1, N]
        alpha_dst = jnp.sum(hh * a_d, axis=-1, keepdims=True)                # [N, 1]
        att = alpha_dst + alpha_src                       # att[dst, src]
        att = jnp.where(att > 0.0, att, 0.2 * att)        # LeakyReLU(0.2)
        att = jnp.where(adj > 0.0, att, -1e9)
        p = _softmax_rows(att)
        out_heads.append(jnp.dot(p, hh, preferred_element_type=jnp.float32))
    gat_nodes = jnp.concatenate(out_heads, axis=-1) + gb_ref[...]   # [N, D] lane-dense

    ls2 = ls2_ref[...]
    post_gat_n = nodes_ln + ls2 * gat_nodes               # residual on LN2 output (ref quirk)
    gat_edges = jnp.dot(edges_ln + embe_ref[0].astype(jnp.float32), wedge_ref[...],
                        preferred_element_type=jnp.float32) + bedge_ref[...]
    post_gat_e = edges_ln + ls2 * gat_edges

    # ---------------- 3) FFN block ----------------
    # LN3 applied to pre_gat while the residual uses post_gat — reference quirk.
    ffn_in = _ln_f32(pre_gat, g3_ref[...], b3_ref[...])
    hid = _gelu(jnp.dot(ffn_in, w1_ref[...], preferred_element_type=jnp.float32)
                + fb1_ref[...])
    y = jnp.dot(hid, w2_ref[...], preferred_element_type=jnp.float32) + fb2_ref[...]

    ls3 = ls3_ref[...]
    on_ref[0] = (post_gat_n + ls3 * y[:N, :]).astype(on_ref.dtype)
    oe_ref[0] = (post_gat_e + ls3 * y[N:, :]).astype(oe_ref.dtype)


# ------------------------------ forward glue --------------------------------

def decoder_layer_forward(params, nodes, edges, emb_nodes, emb_edges,
                          edge_index, features, attn_mask, *, num_heads):
    B, N, D = nodes.shape
    E = edges.shape[1]
    L = N + E
    HW = features.shape[1]
    H = num_heads
    Dh = D // H
    Dff = params["ffn_w1"].shape[1]

    # Queries are the per-batch concat of nodes and edges; all LayerNorm / FFN /
    # LayerScale ops are row-wise, so the batched layout is equivalent to the
    # reference's flat torch.cat([nodes, edges], dim=0).
    pre_cross = jnp.concatenate([nodes, edges], axis=1)          # [B, L, D]
    mask4 = attn_mask.reshape(B, H, L, HW)                       # [B, H, L, HW]

    # Fused K/V projection weights (one [D, 2D] matmul inside the kernel).
    wkv = jnp.concatenate([params["wk"], params["wv"]], axis=1)
    bkv = jnp.concatenate([params["bk"], params["bv"]], axis=0)
    r1 = lambda a: a.reshape(1, -1)

    kernel = functools.partial(_decoder_layer_kernel, num_heads=H, n_nodes=N)

    return pl.pallas_call(
        kernel,
        out_shape=(jax.ShapeDtypeStruct((B, N, D), nodes.dtype),
                   jax.ShapeDtypeStruct((B, E, D), edges.dtype)),
        grid=(B,),
        in_specs=[
            pl.BlockSpec((1, L, D), lambda b: (b, 0, 0)),          # pre_cross queries
            pl.BlockSpec((1, HW, D), lambda b: (b, 0, 0)),         # image features
            pl.BlockSpec((1, H, L, HW), lambda b: (b, 0, 0, 0)),   # attention mask
            pl.BlockSpec((1, N, D), lambda b: (b, 0, 0)),          # node embeddings
            pl.BlockSpec((1, E, D), lambda b: (b, 0, 0)),          # edge embeddings
            pl.BlockSpec((1, 2, E), lambda b: (b, 0, 0)),          # edge_index (int32)
            _bcast((1, D)), _bcast((1, D)),                        # ln1 gamma, beta
            _bcast((D, D)), _bcast((1, D)),                        # wq, bq
            _bcast((D, 2 * D)), _bcast((1, 2 * D)),                # fused wkv, bkv
            _bcast((D, D)), _bcast((1, D)),                        # wo, bo
            _bcast((1, D)),                                        # LayerScale 1
            _bcast((1, D)), _bcast((1, D)),                        # ln2 gamma, beta
            _bcast((D, D)),                                        # gat_w
            _bcast((H, Dh)), _bcast((H, Dh)),                      # a_src, a_dst
            _bcast((1, D)),                                        # gat_bias
            _bcast((D, D)), _bcast((1, D)),                        # w_edge, b_edge
            _bcast((1, D)),                                        # LayerScale 2
            _bcast((1, D)), _bcast((1, D)),                        # ln3 gamma, beta
            _bcast((D, Dff)), _bcast((1, Dff)),                    # ffn w1, b1
            _bcast((Dff, D)), _bcast((1, D)),                      # ffn w2, b2
            _bcast((1, D)),                                        # LayerScale 3
        ],
        out_specs=(pl.BlockSpec((1, N, D), lambda b: (b, 0, 0)),
                   pl.BlockSpec((1, E, D), lambda b: (b, 0, 0))),
        compiler_params=pltpu.CompilerParams(dimension_semantics=("parallel",)),
    )(pre_cross, features, mask4, emb_nodes, emb_edges, edge_index,
      r1(params["ln1_g"]), r1(params["ln1_b"]),
      params["wq"], r1(params["bq"]), wkv, r1(bkv),
      params["wo"], r1(params["bo"]), r1(params["ls1"]),
      r1(params["ln2_g"]), r1(params["ln2_b"]),
      params["gat_w"], params["gat_a_src"], params["gat_a_dst"],
      r1(params["gat_bias"]), params["gat_w_edge"], r1(params["gat_b_edge"]),
      r1(params["ls2"]),
      r1(params["ln3_g"]), r1(params["ln3_b"]),
      params["ffn_w1"], r1(params["ffn_b1"]),
      params["ffn_w2"], r1(params["ffn_b2"]), r1(params["ls3"]))


def init_params(key, D, H):
    Dh = D // H
    ks = jax.random.split(key, 16)
    nrm = lambda k, s: (0.02 * jax.random.normal(k, s, jnp.float32))
    return {
        "ln1_g": jnp.ones((D,), jnp.float32), "ln1_b": jnp.zeros((D,), jnp.float32),
        "ln2_g": jnp.ones((D,), jnp.float32), "ln2_b": jnp.zeros((D,), jnp.float32),
        "ln3_g": jnp.ones((D,), jnp.float32), "ln3_b": jnp.zeros((D,), jnp.float32),
        "ls1": jnp.full((D,), 0.1, jnp.float32),
        "ls2": jnp.full((D,), 0.1, jnp.float32),
        "ls3": jnp.full((D,), 0.1, jnp.float32),
        "wq": nrm(ks[0], (D, D)), "bq": jnp.zeros((D,), jnp.float32),
        "wk": nrm(ks[1], (D, D)), "bk": jnp.zeros((D,), jnp.float32),
        "wv": nrm(ks[2], (D, D)), "bv": jnp.zeros((D,), jnp.float32),
        "wo": nrm(ks[3], (D, D)), "bo": jnp.zeros((D,), jnp.float32),
        "gat_w": nrm(ks[4], (D, D)),
        "gat_a_src": nrm(ks[5], (H, Dh)),
        "gat_a_dst": nrm(ks[6], (H, Dh)),
        "gat_bias": jnp.zeros((D,), jnp.float32),
        "gat_w_edge": nrm(ks[7], (D, D)),
        "gat_b_edge": jnp.zeros((D,), jnp.float32),
        "ffn_w1": nrm(ks[8], (D, 4 * D)), "ffn_b1": jnp.zeros((4 * D,), jnp.float32),
        "ffn_w2": nrm(ks[9], (4 * D, D)), "ffn_b2": jnp.zeros((D,), jnp.float32),
    }


if __name__ == "__main__":
    B, N, E, HW, D, H = 2, 6, 8, 16, 32, 4
    key = jax.random.PRNGKey(0)
    ks = jax.random.split(key, 8)
    nodes = jax.random.normal(ks[0], (B, N, D), jnp.float32)
    edges = jax.random.normal(ks[1], (B, E, D), jnp.float32)
    emb_nodes = 0.1 * jax.random.normal(ks[2], (B, N, D), jnp.float32)
    emb_edges = 0.1 * jax.random.normal(ks[3], (B, E, D), jnp.float32)
    features = jax.random.normal(ks[4], (B, HW, D), jnp.float32)
    attn_mask = 0.1 * jax.random.normal(ks[5], (B * H, N + E, HW), jnp.float32)
    edge_index = jax.random.randint(ks[6], (B, 2, E), 0, N).astype(jnp.int32)
    params = init_params(ks[7], D, H)

    fwd = jax.jit(lambda p, *a: decoder_layer_forward(p, *a, num_heads=H))
    out_nodes, out_edges = fwd(params, nodes, edges, emb_nodes, emb_edges,
                               edge_index, features, attn_mask)
    jax.block_until_ready((out_nodes, out_edges))
    assert out_nodes.shape == (B, N, D) and out_edges.shape == (B, E, D)
    print("KERNEL_OK")
</pallas_src>

<mosaic_0001>
module attributes {stable_mosaic.version = 11 : i64} {
  func.func @_decoder_layer_kernel(%arg0: i32, %arg1: memref<1x14x32xf32, #tpu.memory_space<vmem>>, %arg2: memref<1x16x32xf32, #tpu.memory_space<vmem>>, %arg3: memref<1x4x14x16xf32, #tpu.memory_space<vmem>>, %arg4: memref<1x6x32xf32, #tpu.memory_space<vmem>>, %arg5: memref<1x8x32xf32, #tpu.memory_space<vmem>>, %arg6: memref<1x2x8xi32, #tpu.memory_space<vmem>>, %arg7: memref<1x32xf32, #tpu.memory_space<vmem>>, %arg8: memref<1x32xf32, #tpu.memory_space<vmem>>, %arg9: memref<32x32xf32, #tpu.memory_space<vmem>>, %arg10: memref<1x32xf32, #tpu.memory_space<vmem>>, %arg11: memref<32x64xf32, #tpu.memory_space<vmem>>, %arg12: memref<1x64xf32, #tpu.memory_space<vmem>>, %arg13: memref<32x32xf32, #tpu.memory_space<vmem>>, %arg14: memref<1x32xf32, #tpu.memory_space<vmem>>, %arg15: memref<1x32xf32, #tpu.memory_space<vmem>>, %arg16: memref<1x32xf32, #tpu.memory_space<vmem>>, %arg17: memref<1x32xf32, #tpu.memory_space<vmem>>, %arg18: memref<32x32xf32, #tpu.memory_space<vmem>>, %arg19: memref<4x8xf32, #tpu.memory_space<vmem>>, %arg20: memref<4x8xf32, #tpu.memory_space<vmem>>, %arg21: memref<1x32xf32, #tpu.memory_space<vmem>>, %arg22: memref<32x32xf32, #tpu.memory_space<vmem>>, %arg23: memref<1x32xf32, #tpu.memory_space<vmem>>, %arg24: memref<1x32xf32, #tpu.memory_space<vmem>>, %arg25: memref<1x32xf32, #tpu.memory_space<vmem>>, %arg26: memref<1x32xf32, #tpu.memory_space<vmem>>, %arg27: memref<32x128xf32, #tpu.memory_space<vmem>>, %arg28: memref<1x128xf32, #tpu.memory_space<vmem>>, %arg29: memref<128x32xf32, #tpu.memory_space<vmem>>, %arg30: memref<1x32xf32, #tpu.memory_space<vmem>>, %arg31: memref<1x32xf32, #tpu.memory_space<vmem>>, %arg32: memref<1x6x32xf32, #tpu.memory_space<vmem>>, %arg33: memref<1x8x32xf32, #tpu.memory_space<vmem>>) attributes {dimension_semantics = [#tpu.dimension_semantics<parallel>], iteration_bounds = array<i64: 2>, scalar_prefetch = 0 : i64, scratch_operands = 0 : i64, tpu.core_type = #tpu.core_type<tc>, window_params = [{transform_indices = @transform_0, window_bounds = array<i64: 1, 14, 32>}, {transform_indices = @transform_1, window_bounds = array<i64: 1, 16, 32>}, {transform_indices = @transform_2, window_bounds = array<i64: 1, 4, 14, 16>}, {transform_indices = @transform_3, window_bounds = array<i64: 1, 6, 32>}, {transform_indices = @transform_4, window_bounds = array<i64: 1, 8, 32>}, {transform_indices = @transform_5, window_bounds = array<i64: 1, 2, 8>}, {pipeline_mode = #tpu.pipeline_mode<synchronous>, transform_indices = @transform_6, window_bounds = array<i64: 1, 32>}, {pipeline_mode = #tpu.pipeline_mode<synchronous>, transform_indices = @transform_7, window_bounds = array<i64: 1, 32>}, {pipeline_mode = #tpu.pipeline_mode<synchronous>, transform_indices = @transform_8, window_bounds = array<i64: 32, 32>}, {pipeline_mode = #tpu.pipeline_mode<synchronous>, transform_indices = @transform_9, window_bounds = array<i64: 1, 32>}, {pipeline_mode = #tpu.pipeline_mode<synchronous>, transform_indices = @transform_10, window_bounds = array<i64: 32, 64>}, {pipeline_mode = #tpu.pipeline_mode<synchronous>, transform_indices = @transform_11, window_bounds = array<i64: 1, 64>}, {pipeline_mode = #tpu.pipeline_mode<synchronous>, transform_indices = @transform_12, window_bounds = array<i64: 32, 32>}, {pipeline_mode = #tpu.pipeline_mode<synchronous>, transform_indices = @transform_13, window_bounds = array<i64: 1, 32>}, {pipeline_mode = #tpu.pipeline_mode<synchronous>, transform_indices = @transform_14, window_bounds = array<i64: 1, 32>}, {pipeline_mode = #tpu.pipeline_mode<synchronous>, transform_indices = @transform_15, window_bounds = array<i64: 1, 32>}, {pipeline_mode = #tpu.pipeline_mode<synchronous>, transform_indices = @transform_16, window_bounds = array<i64: 1, 32>}, {pipeline_mode = #tpu.pipeline_mode<synchronous>, transform_indices = @transform_17, window_bounds = array<i64: 32, 32>}, {pipeline_mode = #tpu.pipeline_mode<synchronous>, transform_indices = @transform_18, window_bounds = array<i64: 4, 8>}, {pipeline_mode = #tpu.pipeline_mode<synchronous>, transform_indices = @transform_19, window_bounds = array<i64: 4, 8>}, {pipeline_mode = #tpu.pipeline_mode<synchronous>, transform_indices = @transform_20, window_bounds = array<i64: 1, 32>}, {pipeline_mode = #tpu.pipeline_mode<synchronous>, transform_indices = @transform_21, window_bounds = array<i64: 32, 32>}, {pipeline_mode = #tpu.pipeline_mode<synchronous>, transform_indices = @transform_22, window_bounds = array<i64: 1, 32>}, {pipeline_mode = #tpu.pipeline_mode<synchronous>, transform_indices = @transform_23, window_bounds = array<i64: 1, 32>}, {pipeline_mode = #tpu.pipeline_mode<synchronous>, transform_indices = @transform_24, window_bounds = array<i64: 1, 32>}, {pipeline_mode = #tpu.pipeline_mode<synchronous>, transform_indices = @transform_25, window_bounds = array<i64: 1, 32>}, {pipeline_mode = #tpu.pipeline_mode<synchronous>, transform_indices = @transform_26, window_bounds = array<i64: 32, 128>}, {pipeline_mode = #tpu.pipeline_mode<synchronous>, transform_indices = @transform_27, window_bounds = array<i64: 1, 128>}, {pipeline_mode = #tpu.pipeline_mode<synchronous>, transform_indices = @transform_28, window_bounds = array<i64: 128, 32>}, {pipeline_mode = #tpu.pipeline_mode<synchronous>, transform_indices = @transform_29, window_bounds = array<i64: 1, 32>}, {pipeline_mode = #tpu.pipeline_mode<synchronous>, transform_indices = @transform_30, window_bounds = array<i64: 1, 32>}, {transform_indices = @transform_31, window_bounds = array<i64: 1, 6, 32>}, {transform_indices = @transform_32, window_bounds = array<i64: 1, 8, 32>}]} {
    %c0 = arith.constant 0 : index
    %c0_0 = arith.constant 0 : index
    %c0_1 = arith.constant 0 : index
    %0 = vector.load %arg1[%c0, %c0_0, %c0_1] : memref<1x14x32xf32, #tpu.memory_space<vmem>>, vector<1x14x32xf32>
    %1 = vector.shape_cast %0 : vector<1x14x32xf32> to vector<14x32xf32>
    %c0_2 = arith.constant 0 : index
    %c0_3 = arith.constant 0 : index
    %2 = vector.load %arg7[%c0_2, %c0_3] : memref<1x32xf32, #tpu.memory_space<vmem>>, vector<1x32xf32>
    %c0_4 = arith.constant 0 : index
    %c0_5 = arith.constant 0 : index
    %3 = vector.load %arg8[%c0_4, %c0_5] : memref<1x32xf32, #tpu.memory_space<vmem>>, vector<1x32xf32>
    %cst = arith.constant dense<0.000000e+00> : vector<14xf32>
    %4 = vector.multi_reduction <add>, %1, %cst [1] : vector<14x32xf32> to vector<14xf32>
    %5 = vector.shape_cast %4 : vector<14xf32> to vector<14x1xf32>
    %cst_6 = arith.constant 3.200000e+01 : f32
    %6 = vector.broadcast %cst_6 : f32 to vector<14x1xf32>
    %7 = arith.divf %5, %6 : vector<14x1xf32>
    %8 = vector.broadcast %7 : vector<14x1xf32> to vector<14x32xf32>
    %9 = arith.subf %1, %8 : vector<14x32xf32>
    %10 = arith.mulf %9, %9 : vector<14x32xf32>
    %cst_7 = arith.constant dense<0.000000e+00> : vector<14xf32>
    %11 = vector.multi_reduction <add>, %10, %cst_7 [1] : vector<14x32xf32> to vector<14xf32>
    %12 = vector.shape_cast %11 : vector<14xf32> to vector<14x1xf32>
    %cst_8 = arith.constant 3.200000e+01 : f32
    %13 = vector.broadcast %cst_8 : f32 to vector<14x1xf32>
    %14 = arith.divf %12, %13 : vector<14x1xf32>
    %15 = vector.broadcast %7 : vector<14x1xf32> to vector<14x32xf32>
    %16 = arith.subf %1, %15 : vector<14x32xf32>
    %cst_9 = arith.constant 9.99999974E-6 : f32
    %17 = vector.broadcast %cst_9 : f32 to vector<14x1xf32>
    %18 = arith.addf %14, %17 : vector<14x1xf32>
    %19 = math.rsqrt %18 : vector<14x1xf32>
    %20 = vector.broadcast %19 : vector<14x1xf32> to vector<14x32xf32>
    %21 = arith.mulf %16, %20 : vector<14x32xf32>
    %22 = vector.broadcast %2 : vector<1x32xf32> to vector<14x32xf32>
    %23 = arith.mulf %21, %22 : vector<14x32xf32>
    %24 = vector.broadcast %3 : vector<1x32xf32> to vector<14x32xf32>
    %25 = arith.addf %23, %24 : vector<14x32xf32>
    %c0_10 = arith.constant 0 : index
    %c0_11 = arith.constant 0 : index
    %26 = vector.load %arg9[%c0_10, %c0_11] : memref<32x32xf32, #tpu.memory_space<vmem>>, vector<32x32xf32>
    %cst_12 = arith.constant dense<0.000000e+00> : vector<14x32xf32>
    %27 = tpu.matmul %25, %26, %cst_12 {dimension_numbers = #tpu.dot_dimension_numbers<[1], [0], [0], [1], [0, 0, 1, 1], [], []>} : vector<14x32xf32>, vector<32x32xf32>, vector<14x32xf32> -> vector<14x32xf32>
    %c0_13 = arith.constant 0 : index
    %c0_14 = arith.constant 0 : index
    %28 = vector.load %arg10[%c0_13, %c0_14] : memref<1x32xf32, #tpu.memory_space<vmem>>, vector<1x32xf32>
    %29 = vector.broadcast %28 : vector<1x32xf32> to vector<14x32xf32>
    %30 = arith.addf %27, %29 : vector<14x32xf32>
    %c0_15 = arith.constant 0 : index
    %c0_16 = arith.constant 0 : index
    %c0_17 = arith.constant 0 : index
    %31 = vector.load %arg2[%c0_15, %c0_16, %c0_17] : memref<1x16x32xf32, #tpu.memory_space<vmem>>, vector<1x16x32xf32>
    %32 = vector.shape_cast %31 : vector<1x16x32xf32> to vector<16x32xf32>
    %c0_18 = arith.constant 0 : index
    %c0_19 = arith.constant 0 : index
    %33 = vector.load %arg11[%c0_18, %c0_19] : memref<32x64xf32, #tpu.memory_space<vmem>>, vector<32x64xf32>
    %cst_20 = arith.constant dense<0.000000e+00> : vector<16x64xf32>
    %34 = tpu.matmul %32, %33, %cst_20 {dimension_numbers = #tpu.dot_dimension_numbers<[1], [0], [0], [1], [0, 0, 1, 1], [], []>} : vector<16x32xf32>, vector<32x64xf32>, vector<16x64xf32> -> vector<16x64xf32>
    %c0_21 = arith.constant 0 : index
    %c0_22 = arith.constant 0 : index
    %35 = vector.load %arg12[%c0_21, %c0_22] : memref<1x64xf32, #tpu.memory_space<vmem>>, vector<1x64xf32>
    %36 = vector.broadcast %35 : vector<1x64xf32> to vector<16x64xf32>
    %37 = arith.addf %34, %36 : vector<16x64xf32>
    %38 = vector.extract_strided_slice %37 {offsets = [0, 0], sizes = [16, 32], strides = [1, 1]} : vector<16x64xf32> to vector<16x32xf32>
    %39 = vector.extract_strided_slice %37 {offsets = [0, 32], sizes = [16, 32], strides = [1, 1]} : vector<16x64xf32> to vector<16x32xf32>
    %c0_23 = arith.constant 0 : index
    %c0_24 = arith.constant 0 : index
    %c0_25 = arith.constant 0 : index
    %c0_26 = arith.constant 0 : index
    %40 = vector.load %arg3[%c0_23, %c0_24, %c0_25, %c0_26] : memref<1x4x14x16xf32, #tpu.memory_space<vmem>>, vector<1x4x14x16xf32>
    %41 = vector.shape_cast %40 : vector<1x4x14x16xf32> to vector<4x14x16xf32>
    %42 = vector.extract_strided_slice %30 {offsets = [0, 0], sizes = [14, 8], strides = [1, 1]} : vector<14x32xf32> to vector<14x8xf32>
    %cst_27 = arith.constant 0.353553385 : f32
    %43 = vector.broadcast %cst_27 : f32 to vector<14x8xf32>
    %44 = arith.mulf %42, %43 : vector<14x8xf32>
    %45 = vector.extract_strided_slice %38 {offsets = [0, 0], sizes = [16, 8], strides = [1, 1]} : vector<16x32xf32> to vector<16x8xf32>
    %46 = vector.extract_strided_slice %39 {offsets = [0, 0], sizes = [16, 8], strides = [1, 1]} : vector<16x32xf32> to vector<16x8xf32>
    %cst_28 = arith.constant dense<0.000000e+00> : vector<14x16xf32>
    %47 = tpu.matmul %44, %45, %cst_28 {dimension_numbers = #tpu.dot_dimension_numbers<[1], [1], [0], [0], [0, 0, 1, 0], [], []>} : vector<14x8xf32>, vector<16x8xf32>, vector<14x16xf32> -> vector<14x16xf32>
    %48 = vector.extract_strided_slice %41 {offsets = [0, 0, 0], sizes = [1, 14, 16], strides = [1, 1, 1]} : vector<4x14x16xf32> to vector<1x14x16xf32>
    %49 = vector.shape_cast %48 : vector<1x14x16xf32> to vector<14x16xf32>
    %50 = arith.addf %47, %49 : vector<14x16xf32>
    %cst_29 = arith.constant dense<0xFF800000> : vector<14xf32>
    %51 = vector.multi_reduction <maximumf>, %50, %cst_29 [1] : vector<14x16xf32> to vector<14xf32>
    %52 = vector.shape_cast %51 : vector<14xf32> to vector<14x1xf32>
    %53 = vector.broadcast %52 : vector<14x1xf32> to vector<14x16xf32>
    %54 = arith.subf %50, %53 : vector<14x16xf32>
    %55 = math.exp %54 : vector<14x16xf32>
    %cst_30 = arith.constant dense<0.000000e+00> : vector<14xf32>
    %56 = vector.multi_reduction <add>, %55, %cst_30 [1] : vector<14x16xf32> to vector<14xf32>
    %57 = vector.shape_cast %56 : vector<14xf32> to vector<14x1xf32>
    %58 = tpu.reciprocal %57 {approx = true} : vector<14x1xf32> -> vector<14x1xf32>
    %59 = vector.broadcast %58 : vector<14x1xf32> to vector<14x16xf32>
    %60 = arith.mulf %55, %59 : vector<14x16xf32>
    %cst_31 = arith.constant dense<0.000000e+00> : vector<14x8xf32>
    %61 = tpu.matmul %60, %46, %cst_31 {dimension_numbers = #tpu.dot_dimension_numbers<[1], [0], [0], [1], [0, 0, 1, 1], [], []>} : vector<14x16xf32>, vector<16x8xf32>, vector<14x8xf32> -> vector<14x8xf32>
    %62 = vector.extract_strided_slice %30 {offsets = [0, 8], sizes = [14, 8], strides = [1, 1]} : vector<14x32xf32> to vector<14x8xf32>
    %cst_32 = arith.constant 0.353553385 : f32
    %63 = vector.broadcast %cst_32 : f32 to vector<14x8xf32>
    %64 = arith.mulf %62, %63 : vector<14x8xf32>
    %65 = vector.extract_strided_slice %38 {offsets = [0, 8], sizes = [16, 8], strides = [1, 1]} : vector<16x32xf32> to vector<16x8xf32>
    %66 = vector.extract_strided_slice %39 {offsets = [0, 8], sizes = [16, 8], strides = [1, 1]} : vector<16x32xf32> to vector<16x8xf32>
    %cst_33 = arith.constant dense<0.000000e+00> : vector<14x16xf32>
    %67 = tpu.matmul %64, %65, %cst_33 {dimension_numbers = #tpu.dot_dimension_numbers<[1], [1], [0], [0], [0, 0, 1, 0], [], []>} : vector<14x8xf32>, vector<16x8xf32>, vector<14x16xf32> -> vector<14x16xf32>
    %68 = vector.extract_strided_slice %41 {offsets = [1, 0, 0], sizes = [1, 14, 16], strides = [1, 1, 1]} : vector<4x14x16xf32> to vector<1x14x16xf32>
    %69 = vector.shape_cast %68 : vector<1x14x16xf32> to vector<14x16xf32>
    %70 = arith.addf %67, %69 : vector<14x16xf32>
    %cst_34 = arith.constant dense<0xFF800000> : vector<14xf32>
    %71 = vector.multi_reduction <maximumf>, %70, %cst_34 [1] : vector<14x16xf32> to vector<14xf32>
    %72 = vector.shape_cast %71 : vector<14xf32> to vector<14x1xf32>
    %73 = vector.broadcast %72 : vector<14x1xf32> to vector<14x16xf32>
    %74 = arith.subf %70, %73 : vector<14x16xf32>
    %75 = math.exp %74 : vector<14x16xf32>
    %cst_35 = arith.constant dense<0.000000e+00> : vector<14xf32>
    %76 = vector.multi_reduction <add>, %75, %cst_35 [1] : vector<14x16xf32> to vector<14xf32>
    %77 = vector.shape_cast %76 : vector<14xf32> to vector<14x1xf32>
    %78 = tpu.reciprocal %77 {approx = true} : vector<14x1xf32> -> vector<14x1xf32>
    %79 = vector.broadcast %78 : vector<14x1xf32> to vector<14x16xf32>
    %80 = arith.mulf %75, %79 : vector<14x16xf32>
    %cst_36 = arith.constant dense<0.000000e+00> : vector<14x8xf32>
    %81 = tpu.matmul %80, %66, %cst_36 {dimension_numbers = #tpu.dot_dimension_numbers<[1], [0], [0], [1], [0, 0, 1, 1], [], []>} : vector<14x16xf32>, vector<16x8xf32>, vector<14x8xf32> -> vector<14x8xf32>
    %82 = vector.extract_strided_slice %30 {offsets = [0, 16], sizes = [14, 8], strides = [1, 1]} : vector<14x32xf32> to vector<14x8xf32>
    %cst_37 = arith.constant 0.353553385 : f32
    %83 = vector.broadcast %cst_37 : f32 to vector<14x8xf32>
    %84 = arith.mulf %82, %83 : vector<14x8xf32>
    %85 = vector.extract_strided_slice %38 {offsets = [0, 16], sizes = [16, 8], strides = [1, 1]} : vector<16x32xf32> to vector<16x8xf32>
    %86 = vector.extract_strided_slice %39 {offsets = [0, 16], sizes = [16, 8], strides = [1, 1]} : vector<16x32xf32> to vector<16x8xf32>
    %cst_38 = arith.constant dense<0.000000e+00> : vector<14x16xf32>
    %87 = tpu.matmul %84, %85, %cst_38 {dimension_numbers = #tpu.dot_dimension_numbers<[1], [1], [0], [0], [0, 0, 1, 0], [], []>} : vector<14x8xf32>, vector<16x8xf32>, vector<14x16xf32> -> vector<14x16xf32>
    %88 = vector.extract_strided_slice %41 {offsets = [2, 0, 0], sizes = [1, 14, 16], strides = [1, 1, 1]} : vector<4x14x16xf32> to vector<1x14x16xf32>
    %89 = vector.shape_cast %88 : vector<1x14x16xf32> to vector<14x16xf32>
    %90 = arith.addf %87, %89 : vector<14x16xf32>
    %cst_39 = arith.constant dense<0xFF800000> : vector<14xf32>
    %91 = vector.multi_reduction <maximumf>, %90, %cst_39 [1] : vector<14x16xf32> to vector<14xf32>
    %92 = vector.shape_cast %91 : vector<14xf32> to vector<14x1xf32>
    %93 = vector.broadcast %92 : vector<14x1xf32> to vector<14x16xf32>
    %94 = arith.subf %90, %93 : vector<14x16xf32>
    %95 = math.exp %94 : vector<14x16xf32>
    %cst_40 = arith.constant dense<0.000000e+00> : vector<14xf32>
    %96 = vector.multi_reduction <add>, %95, %cst_40 [1] : vector<14x16xf32> to vector<14xf32>
    %97 = vector.shape_cast %96 : vector<14xf32> to vector<14x1xf32>
    %98 = tpu.reciprocal %97 {approx = true} : vector<14x1xf32> -> vector<14x1xf32>
    %99 = vector.broadcast %98 : vector<14x1xf32> to vector<14x16xf32>
    %100 = arith.mulf %95, %99 : vector<14x16xf32>
    %cst_41 = arith.constant dense<0.000000e+00> : vector<14x8xf32>
    %101 = tpu.matmul %100, %86, %cst_41 {dimension_numbers = #tpu.dot_dimension_numbers<[1], [0], [0], [1], [0, 0, 1, 1], [], []>} : vector<14x16xf32>, vector<16x8xf32>, vector<14x8xf32> -> vector<14x8xf32>
    %102 = vector.extract_strided_slice %30 {offsets = [0, 24], sizes = [14, 8], strides = [1, 1]} : vector<14x32xf32> to vector<14x8xf32>
    %cst_42 = arith.constant 0.353553385 : f32
    %103 = vector.broadcast %cst_42 : f32 to vector<14x8xf32>
    %104 = arith.mulf %102, %103 : vector<14x8xf32>
    %105 = vector.extract_strided_slice %38 {offsets = [0, 24], sizes = [16, 8], strides = [1, 1]} : vector<16x32xf32> to vector<16x8xf32>
    %106 = vector.extract_strided_slice %39 {offsets = [0, 24], sizes = [16, 8], strides = [1, 1]} : vector<16x32xf32> to vector<16x8xf32>
    %cst_43 = arith.constant dense<0.000000e+00> : vector<14x16xf32>
    %107 = tpu.matmul %104, %105, %cst_43 {dimension_numbers = #tpu.dot_dimension_numbers<[1], [1], [0], [0], [0, 0, 1, 0], [], []>} : vector<14x8xf32>, vector<16x8xf32>, vector<14x16xf32> -> vector<14x16xf32>
    %108 = vector.extract_strided_slice %41 {offsets = [3, 0, 0], sizes = [1, 14, 16], strides = [1, 1, 1]} : vector<4x14x16xf32> to vector<1x14x16xf32>
    %109 = vector.shape_cast %108 : vector<1x14x16xf32> to vector<14x16xf32>
    %110 = arith.addf %107, %109 : vector<14x16xf32>
    %cst_44 = arith.constant dense<0xFF800000> : vector<14xf32>
    %111 = vector.multi_reduction <maximumf>, %110, %cst_44 [1] : vector<14x16xf32> to vector<14xf32>
    %112 = vector.shape_cast %111 : vector<14xf32> to vector<14x1xf32>
    %113 = vector.broadcast %112 : vector<14x1xf32> to vector<14x16xf32>
    %114 = arith.subf %110, %113 : vector<14x16xf32>
    %115 = math.exp %114 : vector<14x16xf32>
    %cst_45 = arith.constant dense<0.000000e+00> : vector<14xf32>
    %116 = vector.multi_reduction <add>, %115, %cst_45 [1] : vector<14x16xf32> to vector<14xf32>
    %117 = vector.shape_cast %116 : vector<14xf32> to vector<14x1xf32>
    %118 = tpu.reciprocal %117 {approx = true} : vector<14x1xf32> -> vector<14x1xf32>
    %119 = vector.broadcast %118 : vector<14x1xf32> to vector<14x16xf32>
    %120 = arith.mulf %115, %119 : vector<14x16xf32>
    %cst_46 = arith.constant dense<0.000000e+00> : vector<14x8xf32>
    %121 = tpu.matmul %120, %106, %cst_46 {dimension_numbers = #tpu.dot_dimension_numbers<[1], [0], [0], [1], [0, 0, 1, 1], [], []>} : vector<14x16xf32>, vector<16x8xf32>, vector<14x8xf32> -> vector<14x8xf32>
    %122 = tpu.concatenate %61, %81, %101, %121 in 1 : vector<14x8xf32>, vector<14x8xf32>, vector<14x8xf32>, vector<14x8xf32> -> vector<14x32xf32>
    %c0_47 = arith.constant 0 : index
    %c0_48 = arith.constant 0 : index
    %123 = vector.load %arg13[%c0_47, %c0_48] : memref<32x32xf32, #tpu.memory_space<vmem>>, vector<32x32xf32>
    %cst_49 = arith.constant dense<0.000000e+00> : vector<14x32xf32>
    %124 = tpu.matmul %122, %123, %cst_49 {dimension_numbers = #tpu.dot_dimension_numbers<[1], [0], [0], [1], [0, 0, 1, 1], [], []>} : vector<14x32xf32>, vector<32x32xf32>, vector<14x32xf32> -> vector<14x32xf32>
    %c0_50 = arith.constant 0 : index
    %c0_51 = arith.constant 0 : index
    %125 = vector.load %arg14[%c0_50, %c0_51] : memref<1x32xf32, #tpu.memory_space<vmem>>, vector<1x32xf32>
    %126 = vector.broadcast %125 : vector<1x32xf32> to vector<14x32xf32>
    %127 = arith.addf %124, %126 : vector<14x32xf32>
    %c0_52 = arith.constant 0 : index
    %c0_53 = arith.constant 0 : index
    %128 = vector.load %arg15[%c0_52, %c0_53] : memref<1x32xf32, #tpu.memory_space<vmem>>, vector<1x32xf32>
    %129 = vector.broadcast %128 : vector<1x32xf32> to vector<14x32xf32>
    %130 = arith.mulf %129, %127 : vector<14x32xf32>
    %131 = arith.addf %1, %130 : vector<14x32xf32>
    %c0_54 = arith.constant 0 : index
    %c0_55 = arith.constant 0 : index
    %132 = vector.load %arg16[%c0_54, %c0_55] : memref<1x32xf32, #tpu.memory_space<vmem>>, vector<1x32xf32>
    %c0_56 = arith.constant 0 : index
    %c0_57 = arith.constant 0 : index
    %133 = vector.load %arg17[%c0_56, %c0_57] : memref<1x32xf32, #tpu.memory_space<vmem>>, vector<1x32xf32>
    %cst_58 = arith.constant dense<0.000000e+00> : vector<14xf32>
    %134 = vector.multi_reduction <add>, %131, %cst_58 [1] : vector<14x32xf32> to vector<14xf32>
    %135 = vector.shape_cast %134 : vector<14xf32> to vector<14x1xf32>
    %cst_59 = arith.constant 3.200000e+01 : f32
    %136 = vector.broadcast %cst_59 : f32 to vector<14x1xf32>
    %137 = arith.divf %135, %136 : vector<14x1xf32>
    %138 = vector.broadcast %137 : vector<14x1xf32> to vector<14x32xf32>
    %139 = arith.subf %131, %138 : vector<14x32xf32>
    %140 = arith.mulf %139, %139 : vector<14x32xf32>
    %cst_60 = arith.constant dense<0.000000e+00> : vector<14xf32>
    %141 = vector.multi_reduction <add>, %140, %cst_60 [1] : vector<14x32xf32> to vector<14xf32>
    %142 = vector.shape_cast %141 : vector<14xf32> to vector<14x1xf32>
    %cst_61 = arith.constant 3.200000e+01 : f32
    %143 = vector.broadcast %cst_61 : f32 to vector<14x1xf32>
    %144 = arith.divf %142, %143 : vector<14x1xf32>
    %145 = vector.broadcast %137 : vector<14x1xf32> to vector<14x32xf32>
    %146 = arith.subf %131, %145 : vector<14x32xf32>
    %cst_62 = arith.constant 9.99999974E-6 : f32
    %147 = vector.broadcast %cst_62 : f32 to vector<14x1xf32>
    %148 = arith.addf %144, %147 : vector<14x1xf32>
    %149 = math.rsqrt %148 : vector<14x1xf32>
    %150 = vector.broadcast %149 : vector<14x1xf32> to vector<14x32xf32>
    %151 = arith.mulf %146, %150 : vector<14x32xf32>
    %152 = vector.broadcast %132 : vector<1x32xf32> to vector<14x32xf32>
    %153 = arith.mulf %151, %152 : vector<14x32xf32>
    %154 = vector.broadcast %133 : vector<1x32xf32> to vector<14x32xf32>
    %155 = arith.addf %153, %154 : vector<14x32xf32>
    %156 = vector.extract_strided_slice %155 {offsets = [0, 0], sizes = [6, 32], strides = [1, 1]} : vector<14x32xf32> to vector<6x32xf32>
    %157 = vector.extract_strided_slice %155 {offsets = [6, 0], sizes = [8, 32], strides = [1, 1]} : vector<14x32xf32> to vector<8x32xf32>
    %c0_63 = arith.constant 0 : index
    %c0_64 = arith.constant 0 : index
    %c0_65 = arith.constant 0 : index
    %158 = vector.load %arg4[%c0_63, %c0_64, %c0_65] : memref<1x6x32xf32, #tpu.memory_space<vmem>>, vector<1x6x32xf32>
    %159 = vector.shape_cast %158 : vector<1x6x32xf32> to vector<6x32xf32>
    %160 = arith.addf %156, %159 : vector<6x32xf32>
    %c0_66 = arith.constant 0 : index
    %c0_67 = arith.constant 0 : index
    %161 = vector.load %arg18[%c0_66, %c0_67] : memref<32x32xf32, #tpu.memory_space<vmem>>, vector<32x32xf32>
    %cst_68 = arith.constant dense<0.000000e+00> : vector<6x32xf32>
    %162 = tpu.matmul %160, %161, %cst_68 {dimension_numbers = #tpu.dot_dimension_numbers<[1], [0], [0], [1], [0, 0, 1, 1], [], []>} : vector<6x32xf32>, vector<32x32xf32>, vector<6x32xf32> -> vector<6x32xf32>
    %c0_69 = arith.constant 0 : index
    %c0_70 = arith.constant 0 : index
    %c0_71 = arith.constant 0 : index
    %163 = vector.load %arg6[%c0_69, %c0_70, %c0_71] : memref<1x2x8xi32, #tpu.memory_space<vmem>>, vector<1x2x8xi32>
    %164 = vector.shape_cast %163 : vector<1x2x8xi32> to vector<2x8xi32>
    %165 = vector.extract_strided_slice %164 {offsets = [0, 0], sizes = [1, 8], strides = [1, 1]} : vector<2x8xi32> to vector<1x8xi32>
    %166 = vector.extract_strided_slice %164 {offsets = [1, 0], sizes = [1, 8], strides = [1, 1]} : vector<2x8xi32> to vector<1x8xi32>
    %167 = tpu.iota {dimensions = array<i32: 0>} : vector<6x8xi32>
    %168 = vector.broadcast %165 : vector<1x8xi32> to vector<6x8xi32>
    %169 = arith.cmpi eq, %167, %168 : vector<6x8xi32>
    %170 = arith.extui %169 : vector<6x8xi1> to vector<6x8xi32>
    %171 = arith.sitofp %170 : vector<6x8xi32> to vector<6x8xf32>
    %172 = vector.broadcast %166 : vector<1x8xi32> to vector<6x8xi32>
    %173 = arith.cmpi eq, %167, %172 : vector<6x8xi32>
    %174 = arith.extui %173 : vector<6x8xi1> to vector<6x8xi32>
    %175 = arith.sitofp %174 : vector<6x8xi32> to vector<6x8xf32>
    %cst_72 = arith.constant dense<0.000000e+00> : vector<6x6xf32>
    %176 = tpu.matmul %175, %171, %cst_72 {dimension_numbers = #tpu.dot_dimension_numbers<[1], [1], [0], [0], [0, 0, 1, 0], [], []>} : vector<6x8xf32>, vector<6x8xf32>, vector<6x6xf32> -> vector<6x6xf32>
    %177 = tpu.iota {dimensions = array<i32: 0>} : vector<6x6xi32>
    %178 = tpu.iota {dimensions = array<i32: 1>} : vector<6x6xi32>
    %179 = arith.cmpi eq, %177, %178 : vector<6x6xi32>
    %180 = arith.extui %179 : vector<6x6xi1> to vector<6x6xi32>
    %181 = arith.sitofp %180 : vector<6x6xi32> to vector<6x6xf32>
    %182 = arith.addf %176, %181 : vector<6x6xf32>
    %183 = vector.extract_strided_slice %162 {offsets = [0, 0], sizes = [6, 8], strides = [1, 1]} : vector<6x32xf32> to vector<6x8xf32>
    %c0_73 = arith.constant 0 : index
    %c0_74 = arith.constant 0 : index
    %184 = vector.load %arg19[%c0_73, %c0_74] : memref<4x8xf32, #tpu.memory_space<vmem>>, vector<1x8xf32>
    %c0_75 = arith.constant 0 : index
    %c0_76 = arith.constant 0 : index
    %185 = vector.load %arg20[%c0_75, %c0_76] : memref<4x8xf32, #tpu.memory_space<vmem>>, vector<1x8xf32>
    %cst_77 = arith.constant dense<0.000000e+00> : vector<1x6xf32>
    %186 = tpu.matmul %184, %183, %cst_77 {dimension_numbers = #tpu.dot_dimension_numbers<[1], [1], [0], [0], [0, 0, 1, 0], [], []>} : vector<1x8xf32>, vector<6x8xf32>, vector<1x6xf32> -> vector<1x6xf32>
    %187 = vector.broadcast %185 : vector<1x8xf32> to vector<6x8xf32>
    %188 = arith.mulf %183, %187 : vector<6x8xf32>
    %cst_78 = arith.constant dense<0.000000e+00> : vector<6xf32>
    %189 = vector.multi_reduction <add>, %188, %cst_78 [1] : vector<6x8xf32> to vector<6xf32>
    %190 = vector.shape_cast %189 : vector<6xf32> to vector<6x1xf32>
    %191 = vector.broadcast %190 : vector<6x1xf32> to vector<6x6xf32>
    %192 = vector.broadcast %186 : vector<1x6xf32> to vector<6x6xf32>
    %193 = arith.addf %191, %192 : vector<6x6xf32>
    %cst_79 = arith.constant 0.000000e+00 : f32
    %194 = vector.broadcast %cst_79 : f32 to vector<6x6xf32>
    %195 = arith.cmpf ogt, %193, %194 : vector<6x6xf32>
    %cst_80 = arith.constant 2.000000e-01 : f32
    %196 = vector.broadcast %cst_80 : f32 to vector<6x6xf32>
    %197 = arith.mulf %196, %193 : vector<6x6xf32>
    %198 = arith.select %195, %193, %197 : vector<6x6xi1>, vector<6x6xf32>
    %cst_81 = arith.constant 0.000000e+00 : f32
    %199 = vector.broadcast %cst_81 : f32 to vector<6x6xf32>
    %200 = arith.cmpf ogt, %182, %199 : vector<6x6xf32>
    %cst_82 = arith.constant -1.000000e+09 : f32
    %201 = vector.broadcast %cst_82 : f32 to vector<6x6xf32>
    %202 = arith.select %200, %198, %201 : vector<6x6xi1>, vector<6x6xf32>
    %cst_83 = arith.constant dense<0xFF800000> : vector<6xf32>
    %203 = vector.multi_reduction <maximumf>, %202, %cst_83 [1] : vector<6x6xf32> to vector<6xf32>
    %204 = vector.shape_cast %203 : vector<6xf32> to vector<6x1xf32>
    %205 = vector.broadcast %204 : vector<6x1xf32> to vector<6x6xf32>
    %206 = arith.subf %202, %205 : vector<6x6xf32>
    %207 = math.exp %206 : vector<6x6xf32>
    %cst_84 = arith.constant dense<0.000000e+00> : vector<6xf32>
    %208 = vector.multi_reduction <add>, %207, %cst_84 [1] : vector<6x6xf32> to vector<6xf32>
    %209 = vector.shape_cast %208 : vector<6xf32> to vector<6x1xf32>
    %210 = tpu.reciprocal %209 {approx = true} : vector<6x1xf32> -> vector<6x1xf32>
    %211 = vector.broadcast %210 : vector<6x1xf32> to vector<6x6xf32>
    %212 = arith.mulf %207, %211 : vector<6x6xf32>
    %cst_85 = arith.constant dense<0.000000e+00> : vector<6x8xf32>
    %213 = tpu.matmul %212, %183, %cst_85 {dimension_numbers = #tpu.dot_dimension_numbers<[1], [0], [0], [1], [0, 0, 1, 1], [], []>} : vector<6x6xf32>, vector<6x8xf32>, vector<6x8xf32> -> vector<6x8xf32>
    %214 = vector.extract_strided_slice %162 {offsets = [0, 8], sizes = [6, 8], strides = [1, 1]} : vector<6x32xf32> to vector<6x8xf32>
    %c1 = arith.constant 1 : index
    %c0_86 = arith.constant 0 : index
    %215 = vector.load %arg19[%c1, %c0_86] : memref<4x8xf32, #tpu.memory_space<vmem>>, vector<1x8xf32>
    %c1_87 = arith.constant 1 : index
    %c0_88 = arith.constant 0 : index
    %216 = vector.load %arg20[%c1_87, %c0_88] : memref<4x8xf32, #tpu.memory_space<vmem>>, vector<1x8xf32>
    %cst_89 = arith.constant dense<0.000000e+00> : vector<1x6xf32>
    %217 = tpu.matmul %215, %214, %cst_89 {dimension_numbers = #tpu.dot_dimension_numbers<[1], [1], [0], [0], [0, 0, 1, 0], [], []>} : vector<1x8xf32>, vector<6x8xf32>, vector<1x6xf32> -> vector<1x6xf32>
    %218 = vector.broadcast %216 : vector<1x8xf32> to vector<6x8xf32>
    %219 = arith.mulf %214, %218 : vector<6x8xf32>
    %cst_90 = arith.constant dense<0.000000e+00> : vector<6xf32>
    %220 = vector.multi_reduction <add>, %219, %cst_90 [1] : vector<6x8xf32> to vector<6xf32>
    %221 = vector.shape_cast %220 : vector<6xf32> to vector<6x1xf32>
    %222 = vector.broadcast %221 : vector<6x1xf32> to vector<6x6xf32>
    %223 = vector.broadcast %217 : vector<1x6xf32> to vector<6x6xf32>
    %224 = arith.addf %222, %223 : vector<6x6xf32>
    %cst_91 = arith.constant 0.000000e+00 : f32
    %225 = vector.broadcast %cst_91 : f32 to vector<6x6xf32>
    %226 = arith.cmpf ogt, %224, %225 : vector<6x6xf32>
    %cst_92 = arith.constant 2.000000e-01 : f32
    %227 = vector.broadcast %cst_92 : f32 to vector<6x6xf32>
    %228 = arith.mulf %227, %224 : vector<6x6xf32>
    %229 = arith.select %226, %224, %228 : vector<6x6xi1>, vector<6x6xf32>
    %cst_93 = arith.constant 0.000000e+00 : f32
    %230 = vector.broadcast %cst_93 : f32 to vector<6x6xf32>
    %231 = arith.cmpf ogt, %182, %230 : vector<6x6xf32>
    %cst_94 = arith.constant -1.000000e+09 : f32
    %232 = vector.broadcast %cst_94 : f32 to vector<6x6xf32>
    %233 = arith.select %231, %229, %232 : vector<6x6xi1>, vector<6x6xf32>
    %cst_95 = arith.constant dense<0xFF800000> : vector<6xf32>
    %234 = vector.multi_reduction <maximumf>, %233, %cst_95 [1] : vector<6x6xf32> to vector<6xf32>
    %235 = vector.shape_cast %234 : vector<6xf32> to vector<6x1xf32>
    %236 = vector.broadcast %235 : vector<6x1xf32> to vector<6x6xf32>
    %237 = arith.subf %233, %236 : vector<6x6xf32>
    %238 = math.exp %237 : vector<6x6xf32>
    %cst_96 = arith.constant dense<0.000000e+00> : vector<6xf32>
    %239 = vector.multi_reduction <add>, %238, %cst_96 [1] : vector<6x6xf32> to vector<6xf32>
    %240 = vector.shape_cast %239 : vector<6xf32> to vector<6x1xf32>
    %241 = tpu.reciprocal %240 {approx = true} : vector<6x1xf32> -> vector<6x1xf32>
    %242 = vector.broadcast %241 : vector<6x1xf32> to vector<6x6xf32>
    %243 = arith.mulf %238, %242 : vector<6x6xf32>
    %cst_97 = arith.constant dense<0.000000e+00> : vector<6x8xf32>
    %244 = tpu.matmul %243, %214, %cst_97 {dimension_numbers = #tpu.dot_dimension_numbers<[1], [0], [0], [1], [0, 0, 1, 1], [], []>} : vector<6x6xf32>, vector<6x8xf32>, vector<6x8xf32> -> vector<6x8xf32>
    %245 = vector.extract_strided_slice %162 {offsets = [0, 16], sizes = [6, 8], strides = [1, 1]} : vector<6x32xf32> to vector<6x8xf32>
    %c2 = arith.constant 2 : index
    %c0_98 = arith.constant 0 : index
    %246 = vector.load %arg19[%c2, %c0_98] : memref<4x8xf32, #tpu.memory_space<vmem>>, vector<1x8xf32>
    %c2_99 = arith.constant 2 : index
    %c0_100 = arith.constant 0 : index
    %247 = vector.load %arg20[%c2_99, %c0_100] : memref<4x8xf32, #tpu.memory_space<vmem>>, vector<1x8xf32>
    %cst_101 = arith.constant dense<0.000000e+00> : vector<1x6xf32>
    %248 = tpu.matmul %246, %245, %cst_101 {dimension_numbers = #tpu.dot_dimension_numbers<[1], [1], [0], [0], [0, 0, 1, 0], [], []>} : vector<1x8xf32>, vector<6x8xf32>, vector<1x6xf32> -> vector<1x6xf32>
    %249 = vector.broadcast %247 : vector<1x8xf32> to vector<6x8xf32>
    %250 = arith.mulf %245, %249 : vector<6x8xf32>
    %cst_102 = arith.constant dense<0.000000e+00> : vector<6xf32>
    %251 = vector.multi_reduction <add>, %250, %cst_102 [1] : vector<6x8xf32> to vector<6xf32>
    %252 = vector.shape_cast %251 : vector<6xf32> to vector<6x1xf32>
    %253 = vector.broadcast %252 : vector<6x1xf32> to vector<6x6xf32>
    %254 = vector.broadcast %248 : vector<1x6xf32> to vector<6x6xf32>
    %255 = arith.addf %253, %254 : vector<6x6xf32>
    %cst_103 = arith.constant 0.000000e+00 : f32
    %256 = vector.broadcast %cst_103 : f32 to vector<6x6xf32>
    %257 = arith.cmpf ogt, %255, %256 : vector<6x6xf32>
    %cst_104 = arith.constant 2.000000e-01 : f32
    %258 = vector.broadcast %cst_104 : f32 to vector<6x6xf32>
    %259 = arith.mulf %258, %255 : vector<6x6xf32>
    %260 = arith.select %257, %255, %259 : vector<6x6xi1>, vector<6x6xf32>
    %cst_105 = arith.constant 0.000000e+00 : f32
    %261 = vector.broadcast %cst_105 : f32 to vector<6x6xf32>
    %262 = arith.cmpf ogt, %182, %261 : vector<6x6xf32>
    %cst_106 = arith.constant -1.000000e+09 : f32
    %263 = vector.broadcast %cst_106 : f32 to vector<6x6xf32>
    %264 = arith.select %262, %260, %263 : vector<6x6xi1>, vector<6x6xf32>
    %cst_107 = arith.constant dense<0xFF800000> : vector<6xf32>
    %265 = vector.multi_reduction <maximumf>, %264, %cst_107 [1] : vector<6x6xf32> to vector<6xf32>
    %266 = vector.shape_cast %265 : vector<6xf32> to vector<6x1xf32>
    %267 = vector.broadcast %266 : vector<6x1xf32> to vector<6x6xf32>
    %268 = arith.subf %264, %267 : vector<6x6xf32>
    %269 = math.exp %268 : vector<6x6xf32>
    %cst_108 = arith.constant dense<0.000000e+00> : vector<6xf32>
    %270 = vector.multi_reduction <add>, %269, %cst_108 [1] : vector<6x6xf32> to vector<6xf32>
    %271 = vector.shape_cast %270 : vector<6xf32> to vector<6x1xf32>
    %272 = tpu.reciprocal %271 {approx = true} : vector<6x1xf32> -> vector<6x1xf32>
    %273 = vector.broadcast %272 : vector<6x1xf32> to vector<6x6xf32>
    %274 = arith.mulf %269, %273 : vector<6x6xf32>
    %cst_109 = arith.constant dense<0.000000e+00> : vector<6x8xf32>
    %275 = tpu.matmul %274, %245, %cst_109 {dimension_numbers = #tpu.dot_dimension_numbers<[1], [0], [0], [1], [0, 0, 1, 1], [], []>} : vector<6x6xf32>, vector<6x8xf32>, vector<6x8xf32> -> vector<6x8xf32>
    %276 = vector.extract_strided_slice %162 {offsets = [0, 24], sizes = [6, 8], strides = [1, 1]} : vector<6x32xf32> to vector<6x8xf32>
    %c3 = arith.constant 3 : index
    %c0_110 = arith.constant 0 : index
    %277 = vector.load %arg19[%c3, %c0_110] : memref<4x8xf32, #tpu.memory_space<vmem>>, vector<1x8xf32>
    %c3_111 = arith.constant 3 : index
    %c0_112 = arith.constant 0 : index
    %278 = vector.load %arg20[%c3_111, %c0_112] : memref<4x8xf32, #tpu.memory_space<vmem>>, vector<1x8xf32>
    %cst_113 = arith.constant dense<0.000000e+00> : vector<1x6xf32>
    %279 = tpu.matmul %277, %276, %cst_113 {dimension_numbers = #tpu.dot_dimension_numbers<[1], [1], [0], [0], [0, 0, 1, 0], [], []>} : vector<1x8xf32>, vector<6x8xf32>, vector<1x6xf32> -> vector<1x6xf32>
    %280 = vector.broadcast %278 : vector<1x8xf32> to vector<6x8xf32>
    %281 = arith.mulf %276, %280 : vector<6x8xf32>
    %cst_114 = arith.constant dense<0.000000e+00> : vector<6xf32>
    %282 = vector.multi_reduction <add>, %281, %cst_114 [1] : vector<6x8xf32> to vector<6xf32>
    %283 = vector.shape_cast %282 : vector<6xf32> to vector<6x1xf32>
    %284 = vector.broadcast %283 : vector<6x1xf32> to vector<6x6xf32>
    %285 = vector.broadcast %279 : vector<1x6xf32> to vector<6x6xf32>
    %286 = arith.addf %284, %285 : vector<6x6xf32>
    %cst_115 = arith.constant 0.000000e+00 : f32
    %287 = vector.broadcast %cst_115 : f32 to vector<6x6xf32>
    %288 = arith.cmpf ogt, %286, %287 : vector<6x6xf32>
    %cst_116 = arith.constant 2.000000e-01 : f32
    %289 = vector.broadcast %cst_116 : f32 to vector<6x6xf32>
    %290 = arith.mulf %289, %286 : vector<6x6xf32>
    %291 = arith.select %288, %286, %290 : vector<6x6xi1>, vector<6x6xf32>
    %cst_117 = arith.constant 0.000000e+00 : f32
    %292 = vector.broadcast %cst_117 : f32 to vector<6x6xf32>
    %293 = arith.cmpf ogt, %182, %292 : vector<6x6xf32>
    %cst_118 = arith.constant -1.000000e+09 : f32
    %294 = vector.broadcast %cst_118 : f32 to vector<6x6xf32>
    %295 = arith.select %293, %291, %294 : vector<6x6xi1>, vector<6x6xf32>
    %cst_119 = arith.constant dense<0xFF800000> : vector<6xf32>
    %296 = vector.multi_reduction <maximumf>, %295, %cst_119 [1] : vector<6x6xf32> to vector<6xf32>
    %297 = vector.shape_cast %296 : vector<6xf32> to vector<6x1xf32>
    %298 = vector.broadcast %297 : vector<6x1xf32> to vector<6x6xf32>
    %299 = arith.subf %295, %298 : vector<6x6xf32>
    %300 = math.exp %299 : vector<6x6xf32>
    %cst_120 = arith.constant dense<0.000000e+00> : vector<6xf32>
    %301 = vector.multi_reduction <add>, %300, %cst_120 [1] : vector<6x6xf32> to vector<6xf32>
    %302 = vector.shape_cast %301 : vector<6xf32> to vector<6x1xf32>
    %303 = tpu.reciprocal %302 {approx = true} : vector<6x1xf32> -> vector<6x1xf32>
    %304 = vector.broadcast %303 : vector<6x1xf32> to vector<6x6xf32>
    %305 = arith.mulf %300, %304 : vector<6x6xf32>
    %cst_121 = arith.constant dense<0.000000e+00> : vector<6x8xf32>
    %306 = tpu.matmul %305, %276, %cst_121 {dimension_numbers = #tpu.dot_dimension_numbers<[1], [0], [0], [1], [0, 0, 1, 1], [], []>} : vector<6x6xf32>, vector<6x8xf32>, vector<6x8xf32> -> vector<6x8xf32>
    %307 = tpu.concatenate %213, %244, %275, %306 in 1 : vector<6x8xf32>, vector<6x8xf32>, vector<6x8xf32>, vector<6x8xf32> -> vector<6x32xf32>
    %c0_122 = arith.constant 0 : index
    %c0_123 = arith.constant 0 : index
    %308 = vector.load %arg21[%c0_122, %c0_123] : memref<1x32xf32, #tpu.memory_space<vmem>>, vector<1x32xf32>
    %309 = vector.broadcast %308 : vector<1x32xf32> to vector<6x32xf32>
    %310 = arith.addf %307, %309 : vector<6x32xf32>
    %c0_124 = arith.constant 0 : index
    %c0_125 = arith.constant 0 : index
    %311 = vector.load %arg24[%c0_124, %c0_125] : memref<1x32xf32, #tpu.memory_space<vmem>>, vector<1x32xf32>
    %312 = vector.broadcast %311 : vector<1x32xf32> to vector<6x32xf32>
    %313 = arith.mulf %312, %310 : vector<6x32xf32>
    %314 = arith.addf %156, %313 : vector<6x32xf32>
    %c0_126 = arith.constant 0 : index
    %c0_127 = arith.constant 0 : index
    %c0_128 = arith.constant 0 : index
    %315 = vector.load %arg5[%c0_126, %c0_127, %c0_128] : memref<1x8x32xf32, #tpu.memory_space<vmem>>, vector<1x8x32xf32>
    %316 = vector.shape_cast %315 : vector<1x8x32xf32> to vector<8x32xf32>
    %317 = arith.addf %157, %316 : vector<8x32xf32>
    %c0_129 = arith.constant 0 : index
    %c0_130 = arith.constant 0 : index
    %318 = vector.load %arg22[%c0_129, %c0_130] : memref<32x32xf32, #tpu.memory_space<vmem>>, vector<32x32xf32>
    %cst_131 = arith.constant dense<0.000000e+00> : vector<8x32xf32>
    %319 = tpu.matmul %317, %318, %cst_131 {dimension_numbers = #tpu.dot_dimension_numbers<[1], [0], [0], [1], [0, 0, 1, 1], [], []>} : vector<8x32xf32>, vector<32x32xf32>, vector<8x32xf32> -> vector<8x32xf32>
    %c0_132 = arith.constant 0 : index
    %c0_133 = arith.constant 0 : index
    %320 = vector.load %arg23[%c0_132, %c0_133] : memref<1x32xf32, #tpu.memory_space<vmem>>, vector<1x32xf32>
    %321 = vector.broadcast %320 : vector<1x32xf32> to vector<8x32xf32>
    %322 = arith.addf %319, %321 : vector<8x32xf32>
    %323 = vector.broadcast %311 : vector<1x32xf32> to vector<8x32xf32>
    %324 = arith.mulf %323, %322 : vector<8x32xf32>
    %325 = arith.addf %157, %324 : vector<8x32xf32>
    %c0_134 = arith.constant 0 : index
    %c0_135 = arith.constant 0 : index
    %326 = vector.load %arg25[%c0_134, %c0_135] : memref<1x32xf32, #tpu.memory_space<vmem>>, vector<1x32xf32>
    %c0_136 = arith.constant 0 : index
    %c0_137 = arith.constant 0 : index
    %327 = vector.load %arg26[%c0_136, %c0_137] : memref<1x32xf32, #tpu.memory_space<vmem>>, vector<1x32xf32>
    %cst_138 = arith.constant dense<0.000000e+00> : vector<14xf32>
    %328 = vector.multi_reduction <add>, %155, %cst_138 [1] : vector<14x32xf32> to vector<14xf32>
    %329 = vector.shape_cast %328 : vector<14xf32> to vector<14x1xf32>
    %cst_139 = arith.constant 3.200000e+01 : f32
    %330 = vector.broadcast %cst_139 : f32 to vector<14x1xf32>
    %331 = arith.divf %329, %330 : vector<14x1xf32>
    %332 = vector.broadcast %331 : vector<14x1xf32> to vector<14x32xf32>
    %333 = arith.subf %155, %332 : vector<14x32xf32>
    %334 = arith.mulf %333, %333 : vector<14x32xf32>
    %cst_140 = arith.constant dense<0.000000e+00> : vector<14xf32>
    %335 = vector.multi_reduction <add>, %334, %cst_140 [1] : vector<14x32xf32> to vector<14xf32>
    %336 = vector.shape_cast %335 : vector<14xf32> to vector<14x1xf32>
    %cst_141 = arith.constant 3.200000e+01 : f32
    %337 = vector.broadcast %cst_141 : f32 to vector<14x1xf32>
    %338 = arith.divf %336, %337 : vector<14x1xf32>
    %339 = vector.broadcast %331 : vector<14x1xf32> to vector<14x32xf32>
    %340 = arith.subf %155, %339 : vector<14x32xf32>
    %cst_142 = arith.constant 9.99999974E-6 : f32
    %341 = vector.broadcast %cst_142 : f32 to vector<14x1xf32>
    %342 = arith.addf %338, %341 : vector<14x1xf32>
    %343 = math.rsqrt %342 : vector<14x1xf32>
    %344 = vector.broadcast %343 : vector<14x1xf32> to vector<14x32xf32>
    %345 = arith.mulf %340, %344 : vector<14x32xf32>
    %346 = vector.broadcast %326 : vector<1x32xf32> to vector<14x32xf32>
    %347 = arith.mulf %345, %346 : vector<14x32xf32>
    %348 = vector.broadcast %327 : vector<1x32xf32> to vector<14x32xf32>
    %349 = arith.addf %347, %348 : vector<14x32xf32>
    %c0_143 = arith.constant 0 : index
    %c0_144 = arith.constant 0 : index
    %350 = vector.load %arg27[%c0_143, %c0_144] : memref<32x128xf32, #tpu.memory_space<vmem>>, vector<32x128xf32>
    %cst_145 = arith.constant dense<0.000000e+00> : vector<14x128xf32>
    %351 = tpu.matmul %349, %350, %cst_145 {dimension_numbers = #tpu.dot_dimension_numbers<[1], [0], [0], [1], [0, 0, 1, 1], [], []>} : vector<14x32xf32>, vector<32x128xf32>, vector<14x128xf32> -> vector<14x128xf32>
    %c0_146 = arith.constant 0 : index
    %c0_147 = arith.constant 0 : index
    %352 = vector.load %arg28[%c0_146, %c0_147] : memref<1x128xf32, #tpu.memory_space<vmem>>, vector<1x128xf32>
    %353 = vector.broadcast %352 : vector<1x128xf32> to vector<14x128xf32>
    %354 = arith.addf %351, %353 : vector<14x128xf32>
    %cst_148 = arith.constant 5.000000e-01 : f32
    %355 = vector.broadcast %cst_148 : f32 to vector<14x128xf32>
    %356 = arith.mulf %355, %354 : vector<14x128xf32>
    %cst_149 = arith.constant 0.707106769 : f32
    %357 = vector.broadcast %cst_149 : f32 to vector<14x128xf32>
    %358 = arith.mulf %354, %357 : vector<14x128xf32>
    %359 = math.absf %358 : vector<14x128xf32>
    %cst_150 = arith.constant 0.327591091 : f32
    %360 = vector.broadcast %cst_150 : f32 to vector<14x128xf32>
    %361 = arith.mulf %360, %359 : vector<14x128xf32>
    %cst_151 = arith.constant 1.000000e+00 : f32
    %362 = vector.broadcast %cst_151 : f32 to vector<14x128xf32>
    %363 = arith.addf %362, %361 : vector<14x128xf32>
    %cst_152 = arith.constant 1.000000e+00 : f32
    %364 = vector.broadcast %cst_152 : f32 to vector<14x128xf32>
    %365 = arith.divf %364, %363 : vector<14x128xf32>
    %cst_153 = arith.constant 1.06140542 : f32
    %366 = vector.broadcast %cst_153 : f32 to vector<14x128xf32>
    %367 = arith.mulf %366, %365 : vector<14x128xf32>
    %cst_154 = arith.constant -1.45315206 : f32
    %368 = vector.broadcast %cst_154 : f32 to vector<14x128xf32>
    %369 = arith.addf %367, %368 : vector<14x128xf32>
    %370 = arith.mulf %369, %365 : vector<14x128xf32>
    %cst_155 = arith.constant 1.42141378 : f32
    %371 = vector.broadcast %cst_155 : f32 to vector<14x128xf32>
    %372 = arith.addf %370, %371 : vector<14x128xf32>
    %373 = arith.mulf %372, %365 : vector<14x128xf32>
    %cst_156 = arith.constant -0.284496725 : f32
    %374 = vector.broadcast %cst_156 : f32 to vector<14x128xf32>
    %375 = arith.addf %373, %374 : vector<14x128xf32>
    %376 = arith.mulf %375, %365 : vector<14x128xf32>
    %cst_157 = arith.constant 0.254829586 : f32
    %377 = vector.broadcast %cst_157 : f32 to vector<14x128xf32>
    %378 = arith.addf %376, %377 : vector<14x128xf32>
    %379 = arith.mulf %378, %365 : vector<14x128xf32>
    %cst_158 = arith.constant 0.000000e+00 : f32
    %380 = vector.broadcast %cst_158 : f32 to vector<14x128xf32>
    %381 = arith.subf %380, %359 : vector<14x128xf32>
    %382 = arith.mulf %381, %359 : vector<14x128xf32>
    %383 = math.exp %382 : vector<14x128xf32>
    %384 = arith.mulf %379, %383 : vector<14x128xf32>
    %cst_159 = arith.constant 1.000000e+00 : f32
    %385 = vector.broadcast %cst_159 : f32 to vector<14x128xf32>
    %386 = arith.subf %385, %384 : vector<14x128xf32>
    %cst_160 = arith.constant 0.000000e+00 : f32
    %387 = vector.broadcast %cst_160 : f32 to vector<14x128xf32>
    %388 = arith.cmpf oge, %358, %387 : vector<14x128xf32>
    %cst_161 = arith.constant 0.000000e+00 : f32
    %389 = vector.broadcast %cst_161 : f32 to vector<14x128xf32>
    %390 = arith.subf %389, %386 : vector<14x128xf32>
    %391 = arith.select %388, %386, %390 : vector<14x128xi1>, vector<14x128xf32>
    %cst_162 = arith.constant 1.000000e+00 : f32
    %392 = vector.broadcast %cst_162 : f32 to vector<14x128xf32>
    %393 = arith.addf %392, %391 : vector<14x128xf32>
    %394 = arith.mulf %356, %393 : vector<14x128xf32>
    %c0_163 = arith.constant 0 : index
    %c0_164 = arith.constant 0 : index
    %395 = vector.load %arg29[%c0_163, %c0_164] : memref<128x32xf32, #tpu.memory_space<vmem>>, vector<128x32xf32>
    %cst_165 = arith.constant dense<0.000000e+00> : vector<14x32xf32>
    %396 = tpu.matmul %394, %395, %cst_165 {dimension_numbers = #tpu.dot_dimension_numbers<[1], [0], [0], [1], [0, 0, 1, 1], [], []>} : vector<14x128xf32>, vector<128x32xf32>, vector<14x32xf32> -> vector<14x32xf32>
    %c0_166 = arith.constant 0 : index
    %c0_167 = arith.constant 0 : index
    %397 = vector.load %arg30[%c0_166, %c0_167] : memref<1x32xf32, #tpu.memory_space<vmem>>, vector<1x32xf32>
    %398 = vector.broadcast %397 : vector<1x32xf32> to vector<14x32xf32>
    %399 = arith.addf %396, %398 : vector<14x32xf32>
    %c0_168 = arith.constant 0 : index
    %c0_169 = arith.constant 0 : index
    %400 = vector.load %arg31[%c0_168, %c0_169] : memref<1x32xf32, #tpu.memory_space<vmem>>, vector<1x32xf32>
    %401 = vector.extract_strided_slice %399 {offsets = [0, 0], sizes = [6, 32], strides = [1, 1]} : vector<14x32xf32> to vector<6x32xf32>
    %402 = vector.broadcast %400 : vector<1x32xf32> to vector<6x32xf32>
    %403 = arith.mulf %402, %401 : vector<6x32xf32>
    %404 = arith.addf %314, %403 : vector<6x32xf32>
    %c0_170 = arith.constant 0 : index
    %c0_171 = arith.constant 0 : index
    %c0_172 = arith.constant 0 : index
    %405 = vector.load %arg32[%c0_170, %c0_171, %c0_172] : memref<1x6x32xf32, #tpu.memory_space<vmem>>, vector<1x6x32xf32>
    %406 = vector.shape_cast %405 : vector<1x6x32xf32> to vector<6x32xf32>
    %407 = vector.shape_cast %404 : vector<6x32xf32> to vector<1x6x32xf32>
    tpu.vector_store %arg32[%c0_170, %c0_171, %c0_172], %407 {strides = array<i32>} : memref<1x6x32xf32, #tpu.memory_space<vmem>>, vector<1x6x32xf32>,
    %408 = vector.extract_strided_slice %399 {offsets = [6, 0], sizes = [8, 32], strides = [1, 1]} : vector<14x32xf32> to vector<8x32xf32>
    %409 = vector.broadcast %400 : vector<1x32xf32> to vector<8x32xf32>
    %410 = arith.mulf %409, %408 : vector<8x32xf32>
    %411 = arith.addf %325, %410 : vector<8x32xf32>
    %c0_173 = arith.constant 0 : index
    %c0_174 = arith.constant 0 : index
    %c0_175 = arith.constant 0 : index
    %412 = vector.load %arg33[%c0_173, %c0_174, %c0_175] : memref<1x8x32xf32, #tpu.memory_space<vmem>>, vector<1x8x32xf32>
    %413 = vector.shape_cast %412 : vector<1x8x32xf32> to vector<8x32xf32>
    %414 = vector.shape_cast %411 : vector<8x32xf32> to vector<1x8x32xf32>
    tpu.vector_store %arg33[%c0_173, %c0_174, %c0_175], %414 {strides = array<i32>} : memref<1x8x32xf32, #tpu.memory_space<vmem>>, vector<1x8x32xf32>,
    return
  }
  func.func @transform_0(%arg0: i32) -> (i32, i32, i32) {
    %c0_i32 = arith.constant 0 : i32
    %c0_i32_0 = arith.constant 0 : i32
    %c0_i32_1 = arith.constant 0 : i32
    return %arg0, %c0_i32, %c0_i32_0 : i32, i32, i32
  }
  func.func @transform_1(%arg0: i32) -> (i32, i32, i32) {
    %c0_i32 = arith.constant 0 : i32
    %c0_i32_0 = arith.constant 0 : i32
    %c0_i32_1 = arith.constant 0 : i32
    return %arg0, %c0_i32, %c0_i32_0 : i32, i32, i32
  }
  func.func @transform_2(%arg0: i32) -> (i32, i32, i32, i32) {
    %c0_i32 = arith.constant 0 : i32
    %c0_i32_0 = arith.constant 0 : i32
    %c0_i32_1 = arith.constant 0 : i32
    %c0_i32_2 = arith.constant 0 : i32
    return %arg0, %c0_i32, %c0_i32_0, %c0_i32_1 : i32, i32, i32, i32
  }
  func.func @transform_3(%arg0: i32) -> (i32, i32, i32) {
    %c0_i32 = arith.constant 0 : i32
    %c0_i32_0 = arith.constant 0 : i32
    %c0_i32_1 = arith.constant 0 : i32
    return %arg0, %c0_i32, %c0_i32_0 : i32, i32, i32
  }
  func.func @transform_4(%arg0: i32) -> (i32, i32, i32) {
    %c0_i32 = arith.constant 0 : i32
    %c0_i32_0 = arith.constant 0 : i32
    %c0_i32_1 = arith.constant 0 : i32
    return %arg0, %c0_i32, %c0_i32_0 : i32, i32, i32
  }
  func.func @transform_5(%arg0: i32) -> (i32, i32, i32) {
    %c0_i32 = arith.constant 0 : i32
    %c0_i32_0 = arith.constant 0 : i32
    %c0_i32_1 = arith.constant 0 : i32
    return %arg0, %c0_i32, %c0_i32_0 : i32, i32, i32
  }
  func.func @transform_6(%arg0: i32) -> (i32, i32) {
    %c0_i32 = arith.constant 0 : i32
    %c0_i32_0 = arith.constant 0 : i32
    %c0_i32_1 = arith.constant 0 : i32
    return %c0_i32, %c0_i32_0 : i32, i32
  }
  func.func @transform_7(%arg0: i32) -> (i32, i32) {
    %c0_i32 = arith.constant 0 : i32
    %c0_i32_0 = arith.constant 0 : i32
    %c0_i32_1 = arith.constant 0 : i32
    return %c0_i32, %c0_i32_0 : i32, i32
  }
  func.func @transform_8(%arg0: i32) -> (i32, i32) {
    %c0_i32 = arith.constant 0 : i32
    %c0_i32_0 = arith.constant 0 : i32
    %c0_i32_1 = arith.constant 0 : i32
    return %c0_i32, %c0_i32_0 : i32, i32
  }
  func.func @transform_9(%arg0: i32) -> (i32, i32) {
    %c0_i32 = arith.constant 0 : i32
    %c0_i32_0 = arith.constant 0 : i32
    %c0_i32_1 = arith.constant 0 : i32
    return %c0_i32, %c0_i32_0 : i32, i32
  }
  func.func @transform_10(%arg0: i32) -> (i32, i32) {
    %c0_i32 = arith.constant 0 : i32
    %c0_i32_0 = arith.constant 0 : i32
    %c0_i32_1 = arith.constant 0 : i32
    return %c0_i32, %c0_i32_0 : i32, i32
  }
  func.func @transform_11(%arg0: i32) -> (i32, i32) {
    %c0_i32 = arith.constant 0 : i32
    %c0_i32_0 = arith.constant 0 : i32
    %c0_i32_1 = arith.constant 0 : i32
    return %c0_i32, %c0_i32_0 : i32, i32
  }
  func.func @transform_12(%arg0: i32) -> (i32, i32) {
    %c0_i32 = arith.constant 0 : i32
    %c0_i32_0 = arith.constant 0 : i32
    %c0_i32_1 = arith.constant 0 : i32
    return %c0_i32, %c0_i32_0 : i32, i32
  }
  func.func @transform_13(%arg0: i32) -> (i32, i32) {
    %c0_i32 = arith.constant 0 : i32
    %c0_i32_0 = arith.constant 0 : i32
    %c0_i32_1 = arith.constant 0 : i32
    return %c0_i32, %c0_i32_0 : i32, i32
  }
  func.func @transform_14(%arg0: i32) -> (i32, i32) {
    %c0_i32 = arith.constant 0 : i32
    %c0_i32_0 = arith.constant 0 : i32
    %c0_i32_1 = arith.constant 0 : i32
    return %c0_i32, %c0_i32_0 : i32, i32
  }
  func.func @transform_15(%arg0: i32) -> (i32, i32) {
    %c0_i32 = arith.constant 0 : i32
    %c0_i32_0 = arith.constant 0 : i32
    %c0_i32_1 = arith.constant 0 : i32
    return %c0_i32, %c0_i32_0 : i32, i32
  }
  func.func @transform_16(%arg0: i32) -> (i32, i32) {
    %c0_i32 = arith.constant 0 : i32
    %c0_i32_0 = arith.constant 0 : i32
    %c0_i32_1 = arith.constant 0 : i32
    return %c0_i32, %c0_i32_0 : i32, i32
  }
  func.func @transform_17(%arg0: i32) -> (i32, i32) {
    %c0_i32 = arith.constant 0 : i32
    %c0_i32_0 = arith.constant 0 : i32
    %c0_i32_1 = arith.constant 0 : i32
    return %c0_i32, %c0_i32_0 : i32, i32
  }
  func.func @transform_18(%arg0: i32) -> (i32, i32) {
    %c0_i32 = arith.constant 0 : i32
    %c0_i32_0 = arith.constant 0 : i32
    %c0_i32_1 = arith.constant 0 : i32
    return %c0_i32, %c0_i32_0 : i32, i32
  }
  func.func @transform_19(%arg0: i32) -> (i32, i32) {
    %c0_i32 = arith.constant 0 : i32
    %c0_i32_0 = arith.constant 0 : i32
    %c0_i32_1 = arith.constant 0 : i32
    return %c0_i32, %c0_i32_0 : i32, i32
  }
  func.func @transform_20(%arg0: i32) -> (i32, i32) {
    %c0_i32 = arith.constant 0 : i32
    %c0_i32_0 = arith.constant 0 : i32
    %c0_i32_1 = arith.constant 0 : i32
    return %c0_i32, %c0_i32_0 : i32, i32
  }
  func.func @transform_21(%arg0: i32) -> (i32, i32) {
    %c0_i32 = arith.constant 0 : i32
    %c0_i32_0 = arith.constant 0 : i32
    %c0_i32_1 = arith.constant 0 : i32
    return %c0_i32, %c0_i32_0 : i32, i32
  }
  func.func @transform_22(%arg0: i32) -> (i32, i32) {
    %c0_i32 = arith.constant 0 : i32
    %c0_i32_0 = arith.constant 0 : i32
    %c0_i32_1 = arith.constant 0 : i32
    return %c0_i32, %c0_i32_0 : i32, i32
  }
  func.func @transform_23(%arg0: i32) -> (i32, i32) {
    %c0_i32 = arith.constant 0 : i32
    %c0_i32_0 = arith.constant 0 : i32
    %c0_i32_1 = arith.constant 0 : i32
    return %c0_i32, %c0_i32_0 : i32, i32
  }
  func.func @transform_24(%arg0: i32) -> (i32, i32) {
    %c0_i32 = arith.constant 0 : i32
    %c0_i32_0 = arith.constant 0 : i32
    %c0_i32_1 = arith.constant 0 : i32
    return %c0_i32, %c0_i32_0 : i32, i32
  }
  func.func @transform_25(%arg0: i32) -> (i32, i32) {
    %c0_i32 = arith.constant 0 : i32
    %c0_i32_0 = arith.constant 0 : i32
    %c0_i32_1 = arith.constant 0 : i32
    return %c0_i32, %c0_i32_0 : i32, i32
  }
  func.func @transform_26(%arg0: i32) -> (i32, i32) {
    %c0_i32 = arith.constant 0 : i32
    %c0_i32_0 = arith.constant 0 : i32
    %c0_i32_1 = arith.constant 0 : i32
    return %c0_i32, %c0_i32_0 : i32, i32
  }
  func.func @transform_27(%arg0: i32) -> (i32, i32) {
    %c0_i32 = arith.constant 0 : i32
    %c0_i32_0 = arith.constant 0 : i32
    %c0_i32_1 = arith.constant 0 : i32
    return %c0_i32, %c0_i32_0 : i32, i32
  }
  func.func @transform_28(%arg0: i32) -> (i32, i32) {
    %c0_i32 = arith.constant 0 : i32
    %c0_i32_0 = arith.constant 0 : i32
    %c0_i32_1 = arith.constant 0 : i32
    return %c0_i32, %c0_i32_0 : i32, i32
  }
  func.func @transform_29(%arg0: i32) -> (i32, i32) {
    %c0_i32 = arith.constant 0 : i32
    %c0_i32_0 = arith.constant 0 : i32
    %c0_i32_1 = arith.constant 0 : i32
    return %c0_i32, %c0_i32_0 : i32, i32
  }
  func.func @transform_30(%arg0: i32) -> (i32, i32) {
    %c0_i32 = arith.constant 0 : i32
    %c0_i32_0 = arith.constant 0 : i32
    %c0_i32_1 = arith.constant 0 : i32
    return %c0_i32, %c0_i32_0 : i32, i32
  }
  func.func @transform_31(%arg0: i32) -> (i32, i32, i32) {
    %c0_i32 = arith.constant 0 : i32
    %c0_i32_0 = arith.constant 0 : i32
    %c0_i32_1 = arith.constant 0 : i32
    return %arg0, %c0_i32, %c0_i32_0 : i32, i32, i32
  }
  func.func @transform_32(%arg0: i32) -> (i32, i32, i32) {
    %c0_i32 = arith.constant 0 : i32
    %c0_i32_0 = arith.constant 0 : i32
    %c0_i32_1 = arith.constant 0 : i32
    return %arg0, %c0_i32, %c0_i32_0 : i32, i32, i32
  }
}

</mosaic_0001>

<bundles_post_ra>
// kernel: _lambda_.1
= control target key start
LH: loop header
LB: loop body
LE: loop exit
PB: predicated region body
PF: predicated region fallthrough
CT: control target
= control target key end

     0   :  { %s4489_s6 = smov 1   ;;  %s4490_s10 = smov 2   ;;  %s5191_s0 = inlined_call_operand.smem [shape: u32[33], index: -1, kind: input, shape index: {}] }
   0x1   :  { %s4542_s5 = sld [smem:[%s5191_s0]]   ;;  %s4491_s14 = smov 3  }
   0x2   :  { %s4547_s9 = sld [smem:[%s5191_s0 + %s4489_s6]]   ;;  %s4492_s18 = smov 4  }
   0x3   :  { %s4552_s13 = sld [smem:[%s5191_s0 + %s4490_s10]]   ;;  %s4493_s22 = smov 5  }
   0x4   :  { %s4557_s17 = sld [smem:[%s5191_s0 + %s4491_s14]]   ;;  %s4494_s26 = smov 6  }
   0x5   :  { %s4562_s21 = sld [smem:[%s5191_s0 + %s4492_s18]]   ;;  %s4495_s30 = smov 7  }
   0x6   :  { %s4567_s25 = sld [smem:[%s5191_s0 + %s4493_s22]]   ;;  %s4496_s4 = smov 8  }
   0x7   :  { %5215 = sst [smem:[#allocation5_spill]] %s4542_s5  ;;  %s4497_s10 = smov 9  }
   0x8   :  { %5216 = sst [smem:[#allocation6_spill]] %s4547_s9  ;;  %s4498_s15 = smov 10  }
   0x9   :  { %s4572_s29 = sld [smem:[%s5191_s0 + %s4494_s26]]   ;;  %s4499_s20 = smov 11  }
   0xa   :  { %5217 = sst [smem:[#allocation7_spill]] %s4557_s17  ;;  %s4500_s26 = smov 12  }
   0xb   :  { %5218 = sst [smem:[#allocation8_spill]] %s4562_s21  ;;  %s4501_s1 = smov 13  }
   0xc   :  { %s4577_s3 = sld [smem:[%s5191_s0 + %s4495_s30]]   ;;  %s4502_s7 = smov 14  }
   0xd   :  { %s4582_s8 = sld [smem:[%s5191_s0 + %s4496_s4]]   ;;  %s4504_s22 = smov 16  }
   0xe   :  { %s4587_s14 = sld [smem:[%s5191_s0 + %s4497_s10]]   ;;  %s4505_s28 = smov 17  }
   0xf   :  { %s4592_s19 = sld [smem:[%s5191_s0 + %s4498_s15]]   ;;  %s4503_s15 = smov 15  }
  0x10   :  { %s4597_s24 = sld [smem:[%s5191_s0 + %s4499_s20]]  }
  0x11   :  { %s4602_s30 = sld [smem:[%s5191_s0 + %s4500_s26]]  }
  0x12   :  { %5219 = sst [smem:[#allocation9_spill]] %s4577_s3 }
  0x13   :  { %5220 = sst [smem:[#allocation10_spill]] %s4582_s8 }
  0x14   :  { %s4607_s6 = sld [smem:[%s5191_s0 + %s4501_s1]]  }
  0x15   :  { %s4612_s12 = sld [smem:[%s5191_s0 + %s4502_s7]]   ;;  %s4506_s7 = smov 18  }
  0x16   :  { %s4617_s20 = sld [smem:[%s5191_s0 + %s4503_s15]]   ;;  %s4507_s15 = smov 19  }
  0x17   :  { %s4622_s27 = sld [smem:[%s5191_s0 + %s4504_s22]]   ;;  %s4508_s22 = smov 20  }
  0x18   :  { %s4627_s4 = sld [smem:[%s5191_s0 + %s4505_s28]]   ;;  %s4509_s28 = smov 21  }
  0x19   :  { %s4632_s21 = sld [smem:[%s5191_s0 + %s4506_s7]]   ;;  %s4510_s7 = smov 22  }
  0x1a   :  { %5221 = sst [smem:[#allocation11_spill]] %s4607_s6 }
  0x1b   :  { %5222 = sst [smem:[#allocation12_spill]] %s4612_s12 }
  0x1c   :  { %5223 = sst [smem:[#allocation13_spill]] %s4617_s20 }
  0x1d   :  { %5224 = sst [smem:[#allocation14_spill]] %s4622_s27 }
  0x1e   :  { %5225 = sst [smem:[#allocation15_spill]] %s4627_s4 }
  0x1f   :  { %5226 = sst [smem:[#allocation16_spill]] %s4632_s21 }
  0x20   :  { %s4637_s17 = sld [smem:[%s5191_s0 + %s4507_s15]]   ;;  %s4511_s15 = smov 23  }
  0x21   :  { %s4642_s27 = sld [smem:[%s5191_s0 + %s4508_s22]]   ;;  %s4512_s22 = smov 24  }
  0x22   :  { %s4647_s20 = sld [smem:[%s5191_s0 + %s4509_s28]]   ;;  %s4513_s28 = smov 25  }
  0x23   :  { %s4652_s21 = sld [smem:[%s5191_s0 + %s4510_s7]]   ;;  %s4514_s7 = smov 26  }
  0x26   :  { %5227 = sst [smem:[#allocation17_spill]] %s4637_s17 }
  0x27   :  { %5228 = sst [smem:[#allocation18_spill]] %s4642_s27 }
  0x28   :  { %5229 = sst [smem:[#allocation19_spill]] %s4647_s20 }
  0x29   :  { %5230 = sst [smem:[#allocation20_spill]] %s4652_s21 }
  0x2a   :  { %s4657_s17 = sld [smem:[%s5191_s0 + %s4511_s15]]   ;;  %s4515_s15 = smov 27  }
  0x2b   :  { %s4662_s27 = sld [smem:[%s5191_s0 + %s4512_s22]]   ;;  %s4516_s22 = smov 28  }
  0x2c   :  { %s4667_s20 = sld [smem:[%s5191_s0 + %s4513_s28]]   ;;  %s4517_s28 = smov 29  }
  0x2d   :  { %s4672_s21 = sld [smem:[%s5191_s0 + %s4514_s7]]   ;;  %s4518_s7 = smov 30  }
  0x30   :  { %5231 = sst [smem:[#allocation21_spill]] %s4657_s17 }
  0x31   :  { %5232 = sst [smem:[#allocation22_spill]] %s4662_s27 }
  0x32   :  { %5233 = sst [smem:[#allocation23_spill]] %s4667_s20 }
  0x33   :  { %5234 = sst [smem:[#allocation24_spill]] %s4672_s21 }
  0x34   :  { %s4677_s17 = sld [smem:[%s5191_s0 + %s4515_s15]]   ;;  %s4519_s15 = smov 31  }
  0x35   :  { %s4682_s27 = sld [smem:[%s5191_s0 + %s4516_s22]]   ;;  %s4520_s22 = smov 32  }
  0x36   :  { %s4687_s20 = sld [smem:[%s5191_s0 + %s4517_s28]]  }
  0x37   :  { %s4692_s21 = sld [smem:[%s5191_s0 + %s4518_s7]]  }
  0x3a   :  { %5235 = sst [smem:[#allocation25_spill]] %s4677_s17 }
  0x3b   :  { %5236 = sst [smem:[#allocation26_spill]] %s4682_s27 }
  0x3c   :  { %s4697_s17 = sld [smem:[%s5191_s0 + %s4519_s15]]  }
  0x3d   :  { %s4702_s27 = sld [smem:[%s5191_s0 + %s4520_s22]]  }
  0x3e   :  { %71 = vsyncpa [#allocation3], 0 }
  0x3f   :  { %73 = vsyncpa [#allocation3 + $0x1], 0  ;;  %s4704_s28 = smov 0   ;;  %s4706_s1 = smov 0  }
  0x40   :  { %s4708_s2 = smov 0   ;;  %s4710_s7 = smov 0  }
  0x41 LB: > { %s5237_s8 = sld [smem:[#allocation10_spill]]  ;;  %s4725_s0 = sadd.s32 4294967295, %s4487_s7   ;;  %s4479_s1 = sphi %s4706_s1, %s5268_s1   ;;  %s4475_s28 = sphi %s4704_s28, %s5267_s28   ;;  %s4487_s7 = sphi %s4710_s7, %s5270_s7   ;;  %s4483_s2 = sphi %s4708_s2, %s5269_s2  }
  0x42   : > { %s5238_s4 = sld [smem:[#allocation15_spill]]  ;;  %s3875_s10 = sadd.s32 4294967294, %s4487_s7  }
  0x43   : > { %s4729_s11 = sadd.s32 1, %s4487_s7   ;;  %s793_s15 = sadd.s32 1, %s4483_s2 }
  0x44   : > { %s790_s16 = ssub.s32 %s4487_s7, %s4729_s11  ;;  %p803_p0 = scmp.ne.s32.totalorder %s4483_s2, %s4479_s1 }
  0x45   : > { %p791_p1 = scmp.eq.s32.totalorder %s790_s16, 0  ;;  %p804_p2 = scmp.eq.s32.totalorder %s4725_s0, 1 }
  0x46   : > { %p809_p3 = scmp.ne.s32.totalorder %s4479_s1, %s4475_s28  ;;  %p810_p4 = scmp.eq.s32.totalorder %s3875_s10, 1 }
  0x47   : > { %s4740_s18 = scalar_select %p791_p1, %s4483_s2, %s793_s15  }
  0x48   : > { %p4742_p5 = por %p804_p2, %p803_p0  ;;  %p4746_p6 = por %p810_p4, %p809_p3 }
  0x49   : > { %p3878_p7 = scmp.ge.s32.totalorder %s4487_s7, 1  ;;  %p948_p8 = scmp.lt.s32.totalorder %s4487_s7, 3 }
  0x4b   : > { %p949_p9 = pnand %p3878_p7, %p948_p8 }
  0x4c   : > { %s5241_s5 = sld [smem:[#allocation5_spill]] (!%p949_p9)  ;;  %p1056_p10 = scmp.lt.s32.totalorder (!%p949_p9), %s4725_s0, 1 }
  0x4d   : > { %952 = sbr.rel (%p949_p9) target bundleno = 4468 (0x1174), region = 144  ;;  %s5242_s3 = sld [smem:[#allocation9_spill]] (!%p949_p9) }
  0x4e   : > { %s5243_s9 = sld [smem:[#allocation6_spill]] (!%p949_p9) }
  0x4f   : > { %s5244_s6 = sld [smem:[#allocation11_spill]] (!%p949_p9) }
  0x50   : > { %s5245_s12 = sld [smem:[#allocation12_spill]] (!%p949_p9) }
  0x52   : > { %s4754_s26 = scalar_select %p1056_p10, %s4725_s0, 1  ;;  %vm1091_vm0 = vcmask 261120   ;;  %vm1095_vm1 = vcmask 259072   ;;  %v1139_v14 = vld [vmem:[%s5237_s8 + $0x18] sm:$0xff]  ;;  %v1138_v15 = vld [vmem:[%s5237_s8 + $0x10] sm:$0xff]  ;;  %v1137_v16 = vld [vmem:[%s5237_s8 + $0x8] sm:$0xff] }
  0x53   : > { %4074 = vmatprep.subr.mxu0 %v1139_v14  ;;  %v1136_v17 = vld [vmem:[%s5237_s8] sm:$0xff]  ;;  %v1233_v18 = vld [vmem:[%s4592_s19 + $0x18] sm:$0xff]  ;;  %v1232_v36 = vld [vmem:[%s4592_s19 + $0x10] sm:$0xff]  ;;  %vm1332_vm2 = vcmask 64512   ;;  %vm1424_vm3 = vcmask 128000   ;;  %vm1420_vm4 = vcmask 130048  }
  0x54   : > { %s3969_s10 = sshll.u32 %s4754_s26, 4  ;;  %4075 = vmatpush3.msra.mxu0 %v1139_v14  ;;  %v3890_v26 = vld [vmem:[%s4572_s29] ss:$0 sm:$0xff]  ;;  %v1231_v37 = vld [vmem:[%s4592_s19 + $0x8] sm:$0xff]  ;;  %vm2159_vm5 = vcmask 195584   ;;  %vm4532_vm6 = vmmov 0  }
  0x55   : > { %s1060_s15 = scalar_lea.vmem %s5241_s5, %s3969_s10  ;;  %4076 = vmatprep.subr.mxu0 %v1138_v15  ;;  %v3891_v28 = vld [vmem:[%s5242_s3] ss:$0 sm:$0xff]  ;;  %s1065_s16 = scalar_lea.vmem %s5243_s9, %s3969_s10  ;;  %vm2599_vm9 = vcmask 1045504   ;;  %vm2569_vm10 = vcmask 62464   ;;  %vm2583_vm14 = vcmask 46080   ;;  %vm3293_vm15 = vcmask 1041408  }
  0x56   : > { %v4760_v0 = vld [vmem:[%s1060_s15] sm:$0xff]  ;;  %v4762_v1 = vld [vmem:[%s1060_s15 + $0x8] sm:$0x3f]  ;;  %4077 = vmatpush3.msra.mxu0 %v1138_v15  ;;  %s5197_s10 = smov 120   ;;  %s3971_s15 = sshll.u32 %s4754_s26, 6 }
  0x57   : > { %v1092_v2 = vsel %vm1091_vm0, %v4760_v0, 0.0  ;;  %v1096_v3 = vsel %vm1095_vm1, %v4762_v1, 0.0  ;;  %4078 = vmatprep.subr.mxu0 %v1137_v16  ;;  %v1228_v35 = vld [vmem:[%s1065_s16] sm:$0xff]  ;;  %v1229_v39 = vld [vmem:[%s1065_s16 + $0x8] sm:$0xff]  ;;  %s4827_s16 = scalar_lea.vmem %s4552_s13, %s3971_s15  ;;  %s4522_s15 = smov 96  }
  0x58   : > { %1093 = vadd.xlane.f32.xlu0 %v1092_v2  ;;  %4079 = vmatpush3.msra.mxu0 %v1137_v16  ;;  %v1230_v38 = vld [vmem:[%s4592_s19] sm:$0xff]  ;;  %v1323_v56 = vld [vmem:[%s4827_s16 + $0x8] sm:$0x3f]  ;;  %s5247_s3 = sld [smem:[#allocation7_spill]]  ;;  %s5256_s8 = smov 16  }
  0x59   : > { %4080 = vmatprep.subr.mxu0 %v1136_v17  ;;  %v3892_v41 = vld [vmem:[%s4587_s14] ss:$0 sm:$0xff]  ;;  %s5249_s5 = sld [smem:[#allocation17_spill]]  ;;  %s4533_s9 = smov [#allocation2]  }
  0x5a   : > { %4081 = vmatpush3.msra.mxu0 %v1136_v17  ;;  %v3895_v45 = vld [vmem:[%s4597_s24] ss:$0 sm:$0xff] }
  0x5b   : > { %4085 = vmatprep.subr.mxu0 %v1233_v18  ;;  %v1322_v58 = vld [vmem:[%s4827_s16] sm:$0xff] }
  0x5c   : > { %1097 = vadd.xlane.f32.xlu0 %v1096_v3  ;;  %v1324_v3 = vld [vmem:[%s4827_s16 + $0x10] sm:$0xff] }
  0xe1   : > { %v1094_v4 = vpop.xlane.xlu0 %1093 }
  0xe2   : > { %v1100_v5 = vmul.f32 0.03125, %v1094_v4  ;;  %v1325_v4 = vld [vmem:[%s4827_s16 + $0x18] sm:$0x3f] }
  0xe4   : > { %v1102_v6 = vsub.f32 %v4760_v0, %v1100_v5 }
  0xe5   : > { %v1098_v7 = vpop.xlane.xlu0 %1097 }
  0xe6   : > { %v1101_v8 = vmul.f32 0.03125, %v1098_v7  ;;  %v1104_v9 = vmul.f32 %v1102_v6, %v1102_v6 }
  0xe8   : > { %v1103_v10 = vsub.f32 %v4762_v1, %v1101_v8  ;;  %v1106_v11 = vsel %vm1091_vm0, %v1104_v9, 0.0 }
  0xe9   : > { %1107 = vadd.xlane.f32.xlu1 %v1106_v11 }
  0xea   : > { %v1105_v12 = vmul.f32 %v1103_v10, %v1103_v10 }
  0xec   : > { %v1109_v13 = vsel %vm1095_vm1, %v1105_v12, 0.0 }
  0xed   : > { %1110 = vadd.xlane.f32.xlu1 %v1109_v13 }
 0x172   : > { %v1108_v19 = vpop.xlane.xlu1 %1107 }
 0x173   : > { %v1112_v20 = vmul.f32 0.03125, %v1108_v19 }
 0x175   : > { %v1114_v21 = vadd.f32 1e-05, %v1112_v20 }
 0x176   : > { %v1111_v22 = vpop.xlane.xlu1 %1110 }
 0x177   : > { %4359 = vrsqrt.f32 %v1114_v21  ;;  %v1113_v23 = vmul.f32 0.03125, %v1111_v22 }
 0x179   : > { %v1115_v24 = vadd.f32 1e-05, %v1113_v23 }
 0x17b   : > { %4361 = vrsqrt.f32 %v1115_v24 }
 0x184   : > { %v4360_v25 = vpop.eup %4359 }
 0x185   : > { %v1118_v27 = vmul.f32 %v4360_v25, %v1102_v6 }
 0x187   : > { %v1126_v29 = vmul.f32 %v3890_v26, %v1118_v27 }
 0x188   : > { %v4362_v30 = vpop.eup %4361 }
 0x189   : > { %v1119_v31 = vmul.f32 %v4362_v30, %v1103_v10  ;;  %v1134_v32 = vadd.f32 %v3891_v28, %v1126_v29 }
 0x18b   : > { %v1127_v33 = vmul.f32 %v3890_v26, %v1119_v31  ;;  %4082 = vmatprep.mubr.msk.f32.mxu0 %vm1091_vm0, %v1134_v32 }
 0x18d   : > { %v1135_v34 = vadd.f32 %v3891_v28, %v1127_v33 }
 0x18f   : > { %4083 = vmatmul.mubr.msk.f32.vlgmr.msra.gmra.mxu0 %vm1091_vm0, %v1135_v34 }
 0x190   : > { %4086 = vmatpush3.msra.mxu0 %v1233_v18  ;;  %4093 = vmatprep.mubr.msk.f32.mxu0 %vm1091_vm0, %v1228_v35 }
 0x191   : > { %4087 = vmatprep.subr.mxu0 %v1232_v36 }
 0x192   : > { %4088 = vmatpush3.msra.mxu0 %v1232_v36 }
 0x193   : > { %4089 = vmatprep.subr.mxu0 %v1231_v37 }
 0x194   : > { %4090 = vmatpush3.msra.mxu0 %v1231_v37 }
 0x195   : > { %4091 = vmatprep.subr.mxu0 %v1230_v38 }
 0x196   : > { %4092 = vmatpush3.msra.mxu0 %v1230_v38 }
 0x197   : > { %4094 = vmatmul.mubr.msk.f32.vlgmr.msra.gmra.mxu0 %vm1091_vm0, %v1229_v39 }
 0x24f   : > { %v4084_v40 = vpop.f32.mrf.mxu0 }
 0x250   : > { %v1225_v49 = vadd.f32 %v4084_v40, %v3892_v41 }
 0x251   : > { %v1219_v42 = vpop.f32.mrf.mxu0 }
 0x252   : > { %v1220_v43 = vadd.f32 %v3892_v41, %v1219_v42  ;;  %v4811_v51 = vmul.f32 0.35355338, %v1225_v49 }
 0x254   : > { %v4790_v44 = vmul.f32 0.35355338, %v1220_v43 }
 0x256   : > { %1531 = vrot.lane.b32.xlu1 %v4790_v44, %s5197_s10  ;;  %4100 = vmatprep.mubr.msk.f32.mxu0 %vm1332_vm2, %v4790_v44 }
 0x257   : > { %v4095_v46 = vpop.f32.mrf.mxu0 }
 0x258   : > { %v4797_v47 = vadd.f32 %v4095_v46, %v3895_v45 }
 0x259   : > { %v1313_v48 = vpop.f32.mrf.mxu0 }
 0x25a   : > { %v4799_v50 = vadd.f32 %v3895_v45, %v1313_v48  ;;  %1537 = vrot.lane.b32.xlu0 %v4797_v47, %s5197_s10  ;;  %4096 = vmatprep.subr.msk.mxu0 %vm1332_vm2, %v4797_v47 }
 0x25b   : > { %4097 = vmatpush3.xpose.msk.msra.mxu0 %vm1332_vm2, %v4797_v47 }
 0x25c   : > { %4098 = vmatprep.subr.msk.mxu0 %vm1332_vm2, %v4799_v50  ;;  %1535 = vrot.lane.b32.xlu1 %v4799_v50, %s5197_s10 }
 0x25f   : > { %4099 = vmatpush3.xpose.msk.msra.mxu0 %vm1332_vm2, %v4799_v50 }
 0x260   : > { %1533 = vrot.lane.b32.xlu1 %v4811_v51, %s5197_s10  ;;  %s4523_s10 = smov 88  }
 0x262   : > { %4101 = vmatmul.mubr.msk.f32.vlgmr.msra.gmra.mxu0 %vm1332_vm2, %v4811_v51 }
 0x2c8   : > { %v1532_v52 = vpop.permute.xlu1 %1531 }
 0x2c9   : > { %4114 = vmatprep.mubr.msk.f32.mxu1 %vm1332_vm2, %v1532_v52 }
 0x2cc   : > { %v1538_v53 = vpop.permute.xlu0 %1537 }
 0x2cd   : > { %4110 = vmatprep.subr.msk.mxu1 %vm1332_vm2, %v1538_v53 }
 0x2ce   : > { %4111 = vmatpush3.xpose.msk.msra.mxu1 %vm1332_vm2, %v1538_v53  ;;  %v1536_v54 = vpop.permute.xlu1 %1535 }
 0x2cf   : > { %4112 = vmatprep.subr.msk.mxu1 %vm1332_vm2, %v1536_v54 }
 0x2d2   : > { %4113 = vmatpush3.xpose.msk.msra.mxu1 %vm1332_vm2, %v1536_v54  ;;  %v1534_v55 = vpop.permute.xlu1 %1533 }
 0x2d5   : > { %4115 = vmatmul.mubr.msk.f32.vlgmr.msra.gmra.mxu1 %vm1332_vm2, %v1534_v55 }
 0x322   : > { %v4102_v57 = vpop.f32.mrf.mxu0 }
 0x323   : > { %v1417_v59 = vadd.f32 %v4102_v57, %v1323_v56 }
 0x324   : > { %v1411_v60 = vpop.f32.mrf.mxu0 }
 0x325   : > { %v1412_v61 = vadd.f32 %v1411_v60, %v1322_v58  ;;  %v1425_v62 = vsel %vm1424_vm3, %v1417_v59, -inf  ;;  %v1327_v58 = vld [vmem:[%s4827_s16 + $0x28] sm:$0x3f]  ;;  %v1326_v60 = vld [vmem:[%s4827_s16 + $0x20] sm:$0xff] }
 0x326   : > { %1426 = vmax.xlane.f32.xlu1 %v1425_v62 }
 0x327   : > { %v1421_v63 = vsel %vm1420_vm4, %v1412_v61, -inf }
 0x328   : > { %1422 = vmax.xlane.f32.xlu0 %v1421_v63 }
 0x337   : > { %1444 = vrot.lane.b32.xlu1 %v4799_v50, %s4522_s15 }
 0x33b   : > { %1646 = vrot.lane.b32.xlu1 %v4797_v47, %s4523_s10 }
 0x33f   : > { %1644 = vrot.lane.b32.xlu1 %v4799_v50, %s4523_s10  ;;  %s5199_s10 = smov 112  }
 0x395   : > { %v4116_v2 = vpop.f32.mrf.mxu1 }
 0x396   : > { %v1619_v7 = vadd.f32 %v4116_v2, %v1325_v4 }
 0x397   : > { %v1613_v5 = vpop.f32.mrf.mxu1 }
 0x398   : > { %v1614_v6 = vadd.f32 %v1613_v5, %v1324_v3  ;;  %v1625_v9 = vsel %vm1424_vm3, %v1619_v7, -inf }
 0x39a   : > { %v1622_v8 = vsel %vm1420_vm4, %v1614_v6, -inf }
 0x39b   : > { %1623 = vmax.xlane.f32.xlu0 %v1622_v8 }
 0x39f   : > { %1626 = vmax.xlane.f32.xlu0 %v1625_v9 }
 0x3af   : > { %v1427_v10 = vpop.xlane.xlu1 %1426 }
 0x3b0   : > { %v1429_v11 = vsub.f32 %v1417_v59, %v1427_v10 }
 0x3b1   : > { %v1423_v13 = vpop.xlane.xlu0 %1422 }
 0x3b2   : > { %v1432_v12 = vmul.f32 1.442695, %v1429_v11  ;;  %v1428_v14 = vsub.f32 %v1412_v61, %v1423_v13 }
 0x3b3   : > { %v1445_v25 = vpop.permute.xlu1 %1444 }
 0x3b4   : > { %4363 = vpow2.f32 %v1432_v12  ;;  %v1430_v15 = vmul.f32 1.442695, %v1428_v14 }
 0x3b5   : > { %1446 = vrot.lane.b32.xlu0 %v4797_v47, %s4522_s15  ;;  %s4525_s15 = smov 80  }
 0x3b6   : > { %4365 = vpow2.f32 %v1430_v15 }
 0x3b7   : > { %v1647_v28 = vpop.permute.xlu1 %1646 }
 0x3bb   : > { %v1645_v33 = vpop.permute.xlu1 %1644 }
 0x3c1   : > { %v4364_v16 = vpop.eup %4363 }
 0x3c2   : > { %v1437_v17 = vsel %vm1424_vm3, %v4364_v16, 0.0 }
 0x3c3   : > { %1438 = vadd.xlane.f32.xlu1 %v1437_v17  ;;  %v4366_v18 = vpop.eup %4365 }
 0x3c4   : > { %v1434_v19 = vsel %vm1420_vm4, %v4366_v18, 0.0 }
 0x3d4   : > { %1435 = vadd.xlane.f32.xlu0 %v1434_v19 }
 0x424   : > { %v1624_v20 = vpop.xlane.xlu0 %1623 }
 0x425   : > { %v1628_v21 = vsub.f32 %v1614_v6, %v1624_v20 }
 0x427   : > { %v1630_v22 = vmul.f32 1.442695, %v1628_v21 }
 0x428   : > { %v1627_v23 = vpop.xlane.xlu0 %1626 }
 0x429   : > { %4367 = vpow2.f32 %v1630_v22  ;;  %v1629_v24 = vsub.f32 %v1619_v7, %v1627_v23 }
 0x42b   : > { %v1632_v26 = vmul.f32 1.442695, %v1629_v24 }
 0x42c   : > { %v1447_v27 = vpop.permute.xlu0 %1446 }
 0x42d   : > { %4369 = vpow2.f32 %v1632_v26  ;;  %4103 = vmatprep.subr.mxu0 %v1447_v27  ;;  %v1329_v26 = vld [vmem:[%s4827_s16 + $0x38] sm:$0x3f] }
 0x42e   : > { %4104 = vmatpush3.msra.mxu0 %v1447_v27 }
 0x42f   : > { %4105 = vmatprep.subr.mxu0 %v1445_v25 }
 0x430   : > { %4106 = vmatpush3.msra.mxu0 %v1445_v25 }
 0x431   : > { %4117 = vmatprep.subr.mxu0 %v1647_v28 }
 0x436   : > { %v4368_v29 = vpop.eup %4367 }
 0x437   : > { %v1634_v30 = vsel %vm1420_vm4, %v4368_v29, 0.0 }
 0x438   : > { %1635 = vadd.xlane.f32.xlu0 %v1634_v30 }
 0x43a   : > { %v4370_v31 = vpop.eup %4369 }
 0x43b   : > { %v1637_v32 = vsel %vm1424_vm3, %v4370_v31, 0.0 }
 0x43c   : > { %1638 = vadd.xlane.f32.xlu1 %v1637_v32 }
 0x44c   : > { %v1439_v34 = vpop.xlane.xlu1 %1438 }
 0x44d   : > { %1735 = vrot.lane.b32.xlu1 %v4799_v50, %s5199_s10  ;;  %4371 = vrcp.f32 %v1439_v34 }
 0x44e   : > { %1737 = vrot.lane.b32.xlu0 %v4797_v47, %s5199_s10 }
 0x451   : > { %1733 = vrot.lane.b32.xlu1 %v4811_v51, %s5199_s10 }
 0x452   : > { %1731 = vrot.lane.b32.xlu0 %v4790_v44, %s5199_s10  ;;  %s5201_s10 = smov 104  }
 0x45a   : > { %v4372_v36 = vpop.eup %4371 }
 0x45b   : > { %v1443_v39 = vmul.f32 %v4372_v36, %v4364_v16 }
 0x45d   : > { %v1436_v35 = vpop.xlane.xlu0 %1435 }
 0x45e   : > { %4373 = vrcp.f32 %v1436_v35 }
 0x46b   : > { %v4374_v37 = vpop.eup %4373 }
 0x46c   : > { %v1442_v38 = vmul.f32 %v4374_v37, %v4366_v18 }
 0x46e   : > { %4107 = vmatprep.mubr.msk.f32.mxu0 %vm1420_vm4, %v1442_v38 }
 0x46f   : > { %4108 = vmatmul.mubr.msk.f32.vlgmr.msra.gmra.mxu0 %vm1420_vm4, %v1443_v39 }
 0x470   : > { %4118 = vmatpush3.msra.mxu0 %v1647_v28  ;;  %v1328_v28 = vld [vmem:[%s4827_s16 + $0x30] sm:$0xff]  ;;  %s5203_s16 = smov 16  }
 0x471   : > { %4119 = vmatprep.subr.mxu0 %v1645_v33 }
 0x472   : > { %4120 = vmatpush3.msra.mxu0 %v1645_v33 }
 0x4c1   : > { %v1636_v40 = vpop.xlane.xlu0 %1635 }
 0x4c2   : > { %4375 = vrcp.f32 %v1636_v40 }
 0x4c5   : > { %v1639_v41 = vpop.xlane.xlu1 %1638  ;;  %v1738_v42 = vpop.permute.xlu0 %1737 }
 0x4c6   : > { %4377 = vrcp.f32 %v1639_v41  ;;  %4124 = vmatprep.subr.msk.mxu0 %vm1332_vm2, %v1738_v42 }
 0x4c9   : > { %v1732_v49 = vpop.permute.xlu0 %1731  ;;  %v1736_v52 = vpop.permute.xlu1 %1735 }
 0x4cd   : > { %v1734_v53 = vpop.permute.xlu1 %1733 }
 0x4cf   : > { %v4376_v43 = vpop.eup %4375 }
 0x4d0   : > { %v1642_v45 = vmul.f32 %v4376_v43, %v4368_v29 }
 0x4d2   : > { %4121 = vmatprep.mubr.msk.f32.mxu0 %vm1420_vm4, %v1642_v45 }
 0x4d3   : > { %v4378_v46 = vpop.eup %4377 }
 0x4d4   : > { %v1643_v48 = vmul.f32 %v4378_v46, %v4370_v31 }
 0x4d6   : > { %4122 = vmatmul.mubr.msk.f32.vlgmr.msra.gmra.mxu0 %vm1420_vm4, %v1643_v48 }
 0x4d7   : > { %4125 = vmatpush3.xpose.msk.msra.mxu0 %vm1332_vm2, %v1738_v42  ;;  %4128 = vmatprep.mubr.msk.f32.mxu0 %vm1332_vm2, %v1732_v49 }
 0x4d8   : > { %4126 = vmatprep.subr.msk.mxu0 %vm1332_vm2, %v1736_v52 }
 0x4db   : > { %4127 = vmatpush3.xpose.msk.msra.mxu0 %vm1332_vm2, %v1736_v52 }
 0x4de   : > { %4129 = vmatmul.mubr.msk.f32.vlgmr.msra.gmra.mxu0 %vm1332_vm2, %v1734_v53 }
 0x52f   : > { %v4863_v54 = vpop.f32.mrf.mxu0 }
 0x531   : > { %v4865_v55 = vpop.f32.mrf.mxu0 }
 0x596   : > { %v4867_v56 = vpop.f32.mrf.mxu0 }
 0x598   : > { %v4869_v57 = vpop.f32.mrf.mxu0 }
 0x59e   : > { %v4130_v59 = vpop.f32.mrf.mxu0 }
 0x59f   : > { %v1819_v61 = vadd.f32 %v4130_v59, %v1327_v58  ;;  %v2163_v58 = vld [vmem:[%s4602_s30 + $0x8] sm:$0xff]  ;;  %v2162_v59 = vld [vmem:[%s4602_s30] sm:$0xff] }
 0x5a0   : > { %v1813_v62 = vpop.f32.mrf.mxu0 }
 0x5a1   : > { %v1814_v63 = vadd.f32 %v1813_v62, %v1326_v60  ;;  %v1825_v2 = vsel %vm1424_vm3, %v1819_v61, -inf }
 0x5a2   : > { %1826 = vmax.xlane.f32.xlu1 %v1825_v2 }
 0x5a3   : > { %v1822_v3 = vsel %vm1420_vm4, %v1814_v63, -inf }
 0x5a4   : > { %1823 = vmax.xlane.f32.xlu0 %v1822_v3 }
 0x5b3   : > { %1844 = vrot.lane.b32.xlu1 %v4799_v50, %s4525_s15 }
 0x5b7   : > { %1937 = vrot.lane.b32.xlu1 %v4797_v47, %s5201_s10 }
 0x5bb   : > { %1935 = vrot.lane.b32.xlu1 %v4799_v50, %s5201_s10 }
 0x5bf   : > { %1933 = vrot.lane.b32.xlu1 %v4811_v51, %s5201_s10 }
 0x62b   : > { %v1827_v4 = vpop.xlane.xlu1 %1826 }
 0x62c   : > { %v1829_v5 = vsub.f32 %v1819_v61, %v1827_v4 }
 0x62d   : > { %v1824_v6 = vpop.xlane.xlu0 %1823 }
 0x62e   : > { %v1832_v7 = vmul.f32 1.442695, %v1829_v5  ;;  %v1828_v8 = vsub.f32 %v1814_v63, %v1824_v6 }
 0x62f   : > { %v1845_v15 = vpop.permute.xlu1 %1844 }
 0x630   : > { %4379 = vpow2.f32 %v1832_v7  ;;  %v1830_v9 = vmul.f32 1.442695, %v1828_v8 }
 0x632   : > { %4381 = vpow2.f32 %v1830_v9 }
 0x633   : > { %v1938_v17 = vpop.permute.xlu1 %1937 }
 0x637   : > { %v1936_v22 = vpop.permute.xlu1 %1935 }
 0x63b   : > { %v1934_v23 = vpop.permute.xlu1 %1933 }
 0x63d   : > { %v4380_v10 = vpop.eup %4379 }
 0x63e   : > { %v1837_v11 = vsel %vm1424_vm3, %v4380_v10, 0.0 }
 0x63f   : > { %v4382_v12 = vpop.eup %4381  ;;  %1838 = vadd.xlane.f32.xlu0 %v1837_v11 }
 0x640   : > { %v1834_v13 = vsel %vm1420_vm4, %v4382_v12, 0.0 }
 0x643   : > { %1835 = vadd.xlane.f32.xlu0 %v1834_v13  ;;  %v3925_v13 = vld [vmem:[%s5245_s12] ss:$0 sm:$0xff]  ;;  %s4431_s12 = sshll.u32 %s4533_s9, 4  ;;  %s4432_s12 = int_to_ptr.vmem [resolvable:$false] %s4431_s12 }
 0x659   : > { %1846 = vrot.lane.b32.xlu0 %v4797_v47, %s4525_s15  ;;  %s4527_s15 = smov 72  }
 0x65d   : > { %1931 = vrot.lane.b32.xlu0 %v4790_v44, %s5201_s10  ;;  %s5207_s10 = smov 8  }
 0x6c8   : > { %v1839_v51 = vpop.xlane.xlu0 %1838 }
 0x6c9   : > { %4383 = vrcp.f32 %v1839_v51 }
 0x6cc   : > { %v1836_v14 = vpop.xlane.xlu0 %1835 }
 0x6cd   : > { %4385 = vrcp.f32 %v1836_v14 }
 0x6d0   : > { %v1847_v16 = vpop.permute.xlu0 %1846 }
 0x6d1   : > { %4131 = vmatprep.subr.mxu1 %v1847_v16 }
 0x6d2   : > { %4132 = vmatpush3.msra.mxu1 %v1847_v16 }
 0x6d3   : > { %4133 = vmatprep.subr.mxu1 %v1845_v15 }
 0x6d4   : > { %4134 = vmatpush3.msra.mxu1 %v1845_v15  ;;  %v1932_v44 = vpop.permute.xlu0 %1931 }
 0x6d5   : > { %4138 = vmatprep.subr.msk.mxu1 %vm1332_vm2, %v1938_v17 }
 0x6d6   : > { %v4384_v18 = vpop.eup %4383 }
 0x6d7   : > { %v1843_v21 = vmul.f32 %v4384_v18, %v4380_v10 }
 0x6da   : > { %v4386_v19 = vpop.eup %4385 }
 0x6db   : > { %v1842_v20 = vmul.f32 %v4386_v19, %v4382_v12  ;;  %v3922_v12 = vld [vmem:[%s5244_s6] ss:$0 sm:$0xff]  ;;  %s5255_s6 = smov 24  }
 0x6dd   : > { %4135 = vmatprep.mubr.msk.f32.mxu1 %vm1420_vm4, %v1842_v20 }
 0x6de   : > { %4136 = vmatmul.mubr.msk.f32.vlgmr.msra.gmra.mxu1 %vm1420_vm4, %v1843_v21 }
 0x6df   : > { %4139 = vmatpush3.xpose.msk.msra.mxu1 %vm1332_vm2, %v1938_v17  ;;  %4142 = vmatprep.mubr.msk.f32.mxu1 %vm1332_vm2, %v1932_v44 }
 0x6e0   : > { %4140 = vmatprep.subr.msk.mxu1 %vm1332_vm2, %v1936_v22 }
 0x6e3   : > { %4141 = vmatpush3.xpose.msk.msra.mxu1 %vm1332_vm2, %v1936_v22 }
 0x6e6   : > { %4143 = vmatmul.mubr.msk.f32.vlgmr.msra.gmra.mxu1 %vm1332_vm2, %v1934_v23  ;;  %v4531_v23 = vmov 0.0  }
 0x6e7   : > { %4163 = vmatprep.subr.mxu1 %v4531_v23  ;;  %4171 = vmatprep.mubr.msk.f32.mxu1 %vm4532_vm6, %v4531_v23 }
 0x79e   : > { %v4137_v24 = vpop.f32.mrf.mxu1 }
 0x7a0   : > { %v1922_v25 = vpop.f32.mrf.mxu1 }
 0x7a6   : > { %v4144_v27 = vpop.f32.mrf.mxu1 }
 0x7a7   : > { %v2019_v29 = vadd.f32 %v4144_v27, %v1329_v26  ;;  %v2311_v26 = vld [vmem:[%s5238_s4] sm:$0xff]  ;;  %v2389_v27 = vlaneseq }
 0x7a8   : > { %v2013_v30 = vpop.f32.mrf.mxu1 }
 0x7a9   : > { %v2014_v31 = vadd.f32 %v2013_v30, %v1328_v28  ;;  %v2025_v32 = vsel %vm1424_vm3, %v2019_v29, -inf  ;;  %v4951_v28 = vshrl.u32 %v2389_v27, 7 }
 0x7aa   : > { %2026 = vmax.xlane.f32.xlu1 %v2025_v32 }
 0x7ab   : > { %v2022_v33 = vsel %vm1420_vm4, %v2014_v31, -inf  ;;  %v4954_v30 = vsub.s32 0, %v4951_v28 }
 0x7ac   : > { %2023 = vmax.xlane.f32.xlu0 %v2022_v33 }
 0x7bb   : > { %2044 = vrot.lane.b32.xlu1 %v4799_v50, %s4527_s15 }
 0x7bf   : > { %2133 = vrot.lane.b32.xlu1 %v4869_v57, %s5207_s10  ;;  %v2164_v57 = vld [vmem:[%s4602_s30 + $0x10] sm:$0xff] }
 0x7c3   : > { %2135 = vrot.lane.b32.xlu1 %v4867_v56, %s5207_s10  ;;  %v2165_v56 = vld [vmem:[%s4602_s30 + $0x18] sm:$0xff] }
 0x7c7   : > { %2143 = vrot.lane.b32.xlu1 %v4137_v24, %s5203_s16  ;;  %v2314_v24 = vld [vmem:[%s5238_s4 + $0x18] sm:$0xff] }
 0x7c8   : > { %4164 = vmatpush3.msra.mxu1 %v2314_v24 }
 0x7c9   : > { %4165 = vmatprep.subr.mxu1 %v4531_v23 }
 0x833   : > { %v2027_v34 = vpop.xlane.xlu1 %2026 }
 0x834   : > { %v2029_v35 = vsub.f32 %v2019_v29, %v2027_v34 }
 0x835   : > { %v2024_v36 = vpop.xlane.xlu0 %2023 }
 0x836   : > { %v2032_v37 = vmul.f32 1.442695, %v2029_v35  ;;  %v2028_v38 = vsub.f32 %v2014_v31, %v2024_v36 }
 0x837   : > { %v2045_v48 = vpop.permute.xlu1 %2044 }
 0x838   : > { %4387 = vpow2.f32 %v2032_v37  ;;  %v2030_v39 = vmul.f32 1.442695, %v2028_v38 }
 0x83a   : > { %4389 = vpow2.f32 %v2030_v39 }
 0x83b   : > { %v2134_v62 = vpop.permute.xlu1 %2133 }
 0x83c   : > { %v2155_v4 = vsel %vm1332_vm2, %v4865_v55, %v2134_v62 }
 0x83f   : > { %v2136_v63 = vpop.permute.xlu1 %2135 }
 0x840   : > { %v2156_v6 = vsel %vm1332_vm2, %v4863_v54, %v2136_v63 }
 0x843   : > { %v2144_v2 = vpop.permute.xlu1 %2143 }
 0x844   : > { %v2158_v9 = vsel %vm1420_vm4, %v2156_v6, %v2144_v2 }
 0x845   : > { %v4388_v40 = vpop.eup %4387 }
 0x846   : > { %v2037_v50 = vsel %vm1424_vm3, %v4388_v40, 0.0 }
 0x847   : > { %v4390_v41 = vpop.eup %4389  ;;  %2038 = vadd.xlane.f32.xlu0 %v2037_v50 }
 0x848   : > { %v2034_v42 = vsel %vm1420_vm4, %v4390_v41, 0.0 }
 0x84b   : > { %2035 = vadd.xlane.f32.xlu0 %v2034_v42 }
 0x861   : > { %2046 = vrot.lane.b32.xlu0 %v4797_v47, %s4527_s15  ;;  %s5205_s15 = smov 24  }
 0x865   : > { %2141 = vrot.lane.b32.xlu0 %v1922_v25, %s5203_s16  ;;  %v2312_v25 = vld [vmem:[%s5238_s4 + $0x8] sm:$0xff]  ;;  %s3888_s16 = sshll.u32 %s4754_s26, 1 }
 0x866   : > { %s1082_s10 = scalar_lea.vmem %s4567_s25, %s3888_s16 }
 0x867   : > { %v2388_v29 = vld [vmem:[%s1082_s10] sm:$0x3]  ;;  %s4965_s10 = sshll.u32 %s4754_s26, 3  ;;  %s5250_s26 = sld [smem:[#allocation16_spill]] }
 0x868   : > { %v2394_v31 = vrot.slane %v2388_v29, %v4954_v30  ;;  %s1074_s16 = scalar_lea.vmem %s5247_s3, %s4965_s10  ;;  %s5251_s3 = smov 112  }
 0x869   : > { %v2309_v50 = vld [vmem:[%s1074_s16] sm:$0x3f]  ;;  %s5254_s16 = smov 104  }
 0x86a   : > { %vm2395_vm7 = vcmp.eq.s32.totalorder %v4951_v28, %v2394_v31 }
 0x86b   : > { %v3929_v32 = vsel %vm2395_vm7, 1.0, %v4531_v23 }
 0x86d   : > { %v2862_v2 = vld [vmem:[%s5250_s26 + $0x2] sm:$0x1] }
 0x8d0   : > { %v2039_v43 = vpop.xlane.xlu0 %2038 }
 0x8d1   : > { %4391 = vrcp.f32 %v2039_v43  ;;  %v2400_v43 = vsub.s32 1, %v4951_v28 }
 0x8d4   : > { %v2036_v45 = vpop.xlane.xlu0 %2035 }
 0x8d5   : > { %4393 = vrcp.f32 %v2036_v45  ;;  %v2401_v45 = vrot.slane %v2388_v29, %v2400_v43 }
 0x8d7   : > { %vm2402_vm8 = vcmp.eq.s32.totalorder %v4951_v28, %v2401_v45 }
 0x8d8   : > { %v2047_v46 = vpop.permute.xlu0 %2046 }
 0x8d9   : > { %4145 = vmatprep.subr.mxu0 %v2047_v46 }
 0x8da   : > { %4146 = vmatpush3.msra.mxu0 %v2047_v46  ;;  %v3930_v46 = vsel %vm2402_vm8, 1.0, %v4531_v23 }
 0x8db   : > { %4147 = vmatprep.subr.mxu0 %v2045_v48 }
 0x8dc   : > { %4148 = vmatpush3.msra.mxu0 %v2045_v48  ;;  %v2142_v3 = vpop.permute.xlu0 %2141 }
 0x8dd   : > { %4152 = vmatprep.subr.mxu0 %v2165_v56  ;;  %v2157_v7 = vsel %vm1420_vm4, %v2155_v4, %v2142_v3 }
 0x8de   : > { %v4392_v49 = vpop.eup %4391 }
 0x8df   : > { %v2043_v47 = vmul.f32 %v4392_v49, %v4388_v40 }
 0x8e2   : > { %v4394_v52 = vpop.eup %4393 }
 0x8e3   : > { %v2042_v53 = vmul.f32 %v4394_v52, %v4390_v41  ;;  %v3941_v52 = vld [vmem:[%s5249_s5 + $0x1] ss:$0 sm:$0xff] }
 0x8e5   : > { %4149 = vmatprep.mubr.msk.f32.mxu0 %vm1420_vm4, %v2042_v53  ;;  %v2486_v53 = vld [vmem:[%s5250_s26] sm:$0x1] }
 0x8e6   : > { %4150 = vmatmul.mubr.msk.f32.vlgmr.msra.gmra.mxu0 %vm1420_vm4, %v2043_v47  ;;  %v3951_v47 = vld [vmem:[%s5249_s5 + $0x3] ss:$0 sm:$0xff] }
 0x8e7   : > { %4153 = vmatpush3.msra.mxu0 %v2165_v56  ;;  %v3946_v56 = vld [vmem:[%s5249_s5 + $0x2] ss:$0 sm:$0xff] }
 0x8e8   : > { %4154 = vmatprep.subr.mxu0 %v2164_v57 }
 0x8e9   : > { %4155 = vmatpush3.msra.mxu0 %v2164_v57 }
 0x8ea   : > { %4156 = vmatprep.subr.mxu0 %v2163_v58 }
 0x8eb   : > { %4157 = vmatpush3.msra.mxu0 %v2163_v58 }
 0x8ec   : > { %4158 = vmatprep.subr.mxu0 %v2162_v59 }
 0x8ed   : > { %4159 = vmatpush3.msra.mxu0 %v2162_v59 }
 0x8ee   : > { %4174 = vmatprep.subr.mxu0 %v4531_v23 }
 0x9a6   : > { %v4151_v60 = vpop.f32.mrf.mxu0 }
 0x9a7   : > { %2151 = vrot.lane.b32.xlu1 %v4151_v60, %s5205_s15 }
 0x9a8   : > { %v2122_v61 = vpop.f32.mrf.mxu0 }
 0x9a9   : > { %2149 = vrot.lane.b32.xlu0 %v2122_v61, %s5205_s15  ;;  %s5246_s15 = sld [smem:[#allocation13_spill]]  ;;  %v2672_v61 = vld [vmem:[%s5250_s26 + $0x1] sm:$0x1] }
 0x9af   : > { %v4962_v37 = vld [vmem:[%s5246_s15] ss:$0 sm:$0xff]  ;;  %s5253_s15 = smov 8  }
 0xa19   : > { %v2152_v5 = vpop.permute.xlu1 %2151 }
 0xa1a   : > { %v2161_v11 = vsel %vm2159_vm5, %v2158_v9, %v2152_v5  ;;  %v3052_v5 = vld [vmem:[%s5250_s26 + $0x3] sm:$0x1] }
 0xa1b   : > { %v2150_v8 = vpop.permute.xlu0 %2149 }
 0xa1c   : > { %v2160_v10 = vsel %vm2159_vm5, %v2157_v7, %v2150_v8  ;;  %v3936_v8 = vld [vmem:[%s5249_s5] ss:$0 sm:$0xff]  ;;  %s5262_s5 = sld [smem:[#allocation26_spill]] }
 0xa1d   : > { %4160 = vmatprep.mubr.msk.f32.mxu0 %vm1091_vm0, %v2160_v10 }
 0xa1e   : > { %4161 = vmatmul.mubr.msk.f32.vlgmr.msra.gmra.mxu0 %vm1091_vm0, %v2161_v11 }
 0xa1f   : > { %4176 = vmatprep.mubr.msk.f32.mxu0 %vm4532_vm6, %v4531_v23  ;;  %4175 = vmatpush3.xpose.msk.msra.mxu0 %vm1332_vm2, %v3929_v32 }
 0xa20   : > { %4184 = vmatprep.subr.mxu0 %v4531_v23 }
 0xa22   : > { %4177 = vmatmul.mubr.msk.f32.vlgmr.msra.gmra.mxu0 %vm1332_vm2, %v3930_v46 }
 0xa23   : > { %4186 = vmatprep.mubr.msk.f32.mxu0 %vm4532_vm6, %v4531_v23 }
 0xade   : > { %v4162_v55 = vpop.f32.mrf.mxu0 }
 0xadf   : > { %v2251_v51 = vadd.f32 %v4162_v55, %v3922_v12 }
 0xae0   : > { %v2245_v14 = vpop.f32.mrf.mxu0 }
 0xae1   : > { %v4929_v54 = vmul.f32 %v3925_v13, %v2251_v51  ;;  %v2246_v15 = vadd.f32 %v3922_v12, %v2245_v14 }
 0xae2   : > { %v2482_v55 = vpop.f32.mrf.mxu0 }
 0xae3   : > { %v2261_v16 = vmul.f32 %v3925_v13, %v2246_v15  ;;  %v2264_v57 = vadd.f32 %v4929_v54, %v4762_v1 }
 0xae4   : > { %v4178_v51 = vpop.f32.mrf.mxu0 }
 0xae5   : > { %v2263_v17 = vadd.f32 %v2261_v16, %v4760_v0  ;;  %v2313_v0 = vld [vmem:[%s5238_s4 + $0x10] sm:$0xff]  ;;  %s5248_s4 = sld [smem:[#allocation14_spill]]  ;;  %v2270_v58 = vsel %vm1095_vm1, %v2264_v57, 0.0 }
 0xae6   : > { %4166 = vmatpush3.msra.mxu1 %v2313_v0 }
 0xae7   : > { %v2267_v18 = vsel %vm1091_vm0, %v2263_v17, 0.0  ;;  %4167 = vmatprep.subr.mxu1 %v4531_v23 }
 0xae8   : > { %2268 = vadd.xlane.f32.xlu0 %v2267_v18  ;;  %4168 = vmatpush3.msra.mxu1 %v2312_v25 }
 0xae9   : > { %4169 = vmatprep.subr.mxu1 %v4531_v23 }
 0xaea   : > { %4170 = vmatpush3.msra.mxu1 %v2311_v26  ;;  %v2406_v26 = vand.u32 127, %v2389_v27 }
 0xaeb   : > { %4179 = vmatprep.subr.mxu1 %v4531_v23  ;;  %v4970_v39 = vld [vmem:[%s5248_s4] ss:$0 sm:$0xff]  ;;  %s5252_s4 = smov 120  }
 0xaec   : > { %vm2407_vm11 = vcmp.eq.s32.totalorder %v4951_v28, %v2406_v26 }
 0xaed   : > { %v3931_v29 = vsel %vm2407_vm11, 1.0, %v4531_v23 }
 0xaee   : > { %v2483_v32 = vadd.f32 %v3931_v29, %v2482_v55 }
 0xaf0   : > { %vm2581_vm12 = vcmp.gt.f32.partialorder %v2483_v32, 0.0 }
 0xb71   : > { %v2269_v19 = vpop.xlane.xlu0 %2268 }
 0xb72   : > { %v2273_v20 = vmul.f32 0.03125, %v2269_v19 }
 0xb74   : > { %v2275_v21 = vsub.f32 %v2263_v17, %v2273_v20 }
 0xb76   : > { %v2277_v44 = vmul.f32 %v2275_v21, %v2275_v21 }
 0xb78   : > { %v2279_v22 = vsel %vm1091_vm0, %v2277_v44, 0.0 }
 0xb79   : > { %2280 = vadd.xlane.f32.xlu1 %v2279_v22 }
 0xc02   : > { %v2281_v33 = vpop.xlane.xlu1 %2280 }
 0xc03   : > { %v2285_v34 = vmul.f32 0.03125, %v2281_v33 }
 0xc05   : > { %v2287_v35 = vadd.f32 1e-05, %v2285_v34 }
 0xc07   : > { %4395 = vrsqrt.f32 %v2287_v35 }
 0xc14   : > { %v4396_v36 = vpop.eup %4395 }
 0xc15   : > { %v2291_v38 = vmul.f32 %v4396_v36, %v2275_v21 }
 0xc17   : > { %v2299_v40 = vmul.f32 %v4962_v37, %v2291_v38 }
 0xc19   : > { %v4974_v41 = vadd.f32 %v4970_v39, %v2299_v40 }
 0xc1b   : > { %v2310_v42 = vadd.f32 %v2309_v50, %v4974_v41 }
 0xc1d   : > { %4172 = vmatmul.mubr.msk.f32.vlgmr.msra.gmra.mxu1 %vm1091_vm0, %v2310_v42 }
 0xc1e   : > { %4181 = vmatprep.mubr.msk.f32.mxu1 %vm4532_vm6, %v4531_v23 }
 0xcdd   : > { %v2384_v48 = vpop.f32.mrf.mxu1 }
 0xcde   : > { %2864 = vrot.lane.b32.xlu1 %v2384_v48, %s5251_s3  ;;  %2674 = vrot.lane.b32.xlu0 %v2384_v48, %s5252_s4  ;;  %v2568_v9 = vmul.f32 %v3936_v8, %v2384_v48 }
 0xcdf   : > { %4180 = vmatpush3.xpose.msk.msra.mxu1 %vm1332_vm2, %v2384_v48  ;;  %4185 = vmatpush3.msk.msra.mxu0 %vm2599_vm9, %v2384_v48  ;;  %v4173_v49 = vpop.f32.mrf.mxu1 }
 0xce0   : > { %4189 = vmatprep.subr.mxu1 %v4531_v23  ;;  %4194 = vmatprep.subr.mxu0 %v4531_v23  ;;  %v2570_v10 = vsel %vm2569_vm10, %v2568_v9, 0.0 }
 0xce2   : > { %2756 = vrot.lane.b32.xlu1 %v3941_v52, %s5253_s15  ;;  %3054 = vrot.lane.b32.xlu0 %v2384_v48, %s5254_s16 }
 0xce3   : > { %4182 = vmatmul.mubr.msk.f32.vlgmr.msra.gmra.mxu1 %vm1332_vm2, %v2486_v53 }
 0xce4   : > { %4191 = vmatprep.mubr.msk.f32.mxu1 %vm4532_vm6, %v4531_v23 }
 0xce6   : > { %3136 = vrot.lane.b32.xlu1 %v3951_v47, %s5255_s6  ;;  %2946 = vrot.lane.b32.xlu0 %v3946_v56, %s5256_s8 }
 0xd05   : > { %2271 = vadd.xlane.f32.xlu0 %v2270_v58 }
 0xd50   : > { %v5006_v59 = vpop.permute.xlu1 %2864  ;;  %v5008_v60 = vpop.permute.xlu0 %2674 }
 0xd51   : > { %4190 = vmatpush3.xpose.msk.msra.mxu1 %vm1332_vm2, %v5008_v60 }
 0xd52   : > { %4199 = vmatprep.subr.mxu1 %v4531_v23 }
 0xd54   : > { %v2757_v62 = vpop.permute.xlu1 %2756  ;;  %v5014_v63 = vpop.permute.xlu0 %3054  ;;  %4192 = vmatmul.mubr.msk.f32.vlgmr.msra.gmra.mxu1 %vm1332_vm2, %v2672_v61 }
 0xd55   : > { %v2759_v1 = vmul.f32 %v2757_v62, %v2384_v48  ;;  %4200 = vmatpush3.xpose.msk.msra.mxu1 %vm1332_vm2, %v5006_v59  ;;  %4201 = vmatprep.mubr.msk.f32.mxu1 %vm4532_vm6, %v4531_v23 }
 0xd56   : > { %4209 = vmatprep.subr.mxu1 %v4531_v23 }
 0xd57   : > { %2761 = vrot.lane.b32.xlu1 %v2759_v1, %s5252_s4  ;;  %s5257_s4 = sld [smem:[#allocation19_spill]] }
 0xd58   : > { %v2947_v3 = vpop.permute.xlu0 %2946  ;;  %4202 = vmatmul.mubr.msk.f32.vlgmr.msra.gmra.mxu1 %vm1332_vm2, %v2862_v2  ;;  %v3137_v6 = vpop.permute.xlu1 %3136 }
 0xd59   : > { %v2949_v4 = vmul.f32 %v2947_v3, %v2384_v48  ;;  %4210 = vmatpush3.xpose.msk.msra.mxu1 %vm1332_vm2, %v5014_v63  ;;  %4211 = vmatprep.mubr.msk.f32.mxu1 %vm4532_vm6, %v4531_v23  ;;  %v3139_v7 = vmul.f32 %v3137_v6, %v2384_v48 }
 0xd5a   : > { %4219 = vmatprep.subr.mxu1 %v4531_v23 }
 0xd5b   : > { %2951 = vrot.lane.b32.xlu1 %v2949_v4, %s5251_s3  ;;  %s5258_s3 = sld [smem:[#allocation8_spill]] }
 0xd5c   : > { %4212 = vmatmul.mubr.msk.f32.vlgmr.msra.gmra.mxu1 %vm1332_vm2, %v3052_v5 }
 0xd5d   : > { %4227 = vmatprep.mubr.msk.f32.mxu1 %vm4532_vm6, %v4531_v23  ;;  %v3283_v17 = vld [vmem:[%s5257_s4 + $0x18] sm:$0xff]  ;;  %v3282_v18 = vld [vmem:[%s5257_s4 + $0x10] sm:$0xff]  ;;  %v3281_v19 = vld [vmem:[%s5257_s4 + $0x8] sm:$0xff] }
 0xd5e   : > { %4220 = vmatpush3.msra.mxu1 %v3283_v17  ;;  %v3280_v20 = vld [vmem:[%s5257_s4] sm:$0xff]  ;;  %s5261_s4 = sld [smem:[#allocation23_spill]] }
 0xd5f   : > { %3141 = vrot.lane.b32.xlu1 %v3139_v7, %s5254_s16  ;;  %4221 = vmatprep.subr.mxu1 %v4531_v23 }
 0xd60   : > { %4222 = vmatpush3.msra.mxu1 %v3282_v18  ;;  %v3377_v18 = vsel %vm1091_vm0, %v4974_v41, 0.0 }
 0xd61   : > { %4223 = vmatprep.subr.mxu1 %v4531_v23  ;;  %s1078_s16 = scalar_lea.vmem %s5258_s3, %s4965_s10  ;;  %s5259_s3 = sld [smem:[#allocation24_spill]] }
 0xd62   : > { %4224 = vmatpush3.msra.mxu1 %v3281_v19  ;;  %v3274_v52 = vld [vmem:[%s1078_s16] sm:$0xff]  ;;  %s5260_s16 = sld [smem:[#allocation22_spill]] }
 0xd63   : > { %4225 = vmatprep.subr.mxu1 %v4531_v23  ;;  %v3276_v56 = vrot.slane %v3274_v52, 2 }
 0xd64   : > { %4226 = vmatpush3.msra.mxu1 %v3280_v20 }
 0xd65   : > { %v3278_v61 = vadd.f32 %v3276_v56, %v4974_v41 }
 0xd67   : > { %v3294_v1 = vrot.slane %v3278_v61, 6 }
 0xd83   : > { %2571 = vadd.xlane.f32.xlu1 %v2570_v10 }
 0xd8e   : > { %v2272_v11 = vpop.xlane.xlu0 %2271 }
 0xd8f   : > { %v2274_v12 = vmul.f32 0.03125, %v2272_v11 }
 0xd91   : > { %v2276_v13 = vsub.f32 %v2264_v57, %v2274_v12 }
 0xd93   : > { %v2278_v14 = vmul.f32 %v2276_v13, %v2276_v13 }
 0xd95   : > { %v2282_v54 = vsel %vm1095_vm1, %v2278_v14, 0.0 }
 0xd96   : > { %2283 = vadd.xlane.f32.xlu0 %v2282_v54 }
 0xda3   : > { %v2560_v15 = vpop.f32.mrf.mxu1 }
 0xda4   : > { %v2576_v31 = vrot.slane %v2560_v15, %v4954_v30 }
 0xda5   : > { %v4183_v16 = vpop.f32.mrf.mxu1 }
 0xdc9   : > { %v2762_v21 = vpop.permute.xlu1 %2761 }
 0xdca   : > { %v2764_v44 = vsel %vm2569_vm10, %v2762_v21, 0.0 }
 0xdcb   : > { %2765 = vadd.xlane.f32.xlu0 %v2764_v44 }
 0xdcd   : > { %v2952_v22 = vpop.permute.xlu1 %2951 }
 0xdce   : > { %v2954_v24 = vsel %vm2569_vm10, %v2952_v22, 0.0 }
 0xdcf   : > { %2955 = vadd.xlane.f32.xlu0 %v2954_v24 }
 0xdd1   : > { %v3142_v0 = vpop.permute.xlu1 %3141 }
 0xdd2   : > { %v3144_v25 = vsel %vm2569_vm10, %v3142_v0, 0.0  ;;  %vm2595_vm10 = vcmask 48128  }
 0xdd3   : > { %3145 = vadd.xlane.f32.xlu0 %v3144_v25 }
 0xe0c   : > { %v2572_v33 = vpop.xlane.xlu1 %2571 }
 0xe0d   : > { %v2577_v34 = vadd.f32 %v2576_v31, %v2572_v33 }
 0xe0f   : > { %v2579_v35 = vmul.f32 0.2, %v2577_v34  ;;  %vm2578_vm13 = vcmp.gt.f32.partialorder %v2577_v34, 0.0 }
 0xe11   : > { %v2580_v36 = vsel %vm2578_vm13, %v2577_v34, %v2579_v35 }
 0xe12   : > { %v2582_v38 = vsel %vm2581_vm12, %v2580_v36, -1e+09 }
 0xe13   : > { %v2584_v27 = vsel %vm2583_vm14, %v2582_v38, -inf }
 0xe14   : > { %2585 = vmax.xlane.f32.xlu0 %v2584_v27  ;;  %v2747_v28 = vpop.f32.mrf.mxu1 }
 0xe15   : > { %v2770_v4 = vrot.slane %v2747_v28, %v4954_v30 }
 0xe16   : > { %v4193_v40 = vpop.f32.mrf.mxu1 }
 0xe18   : > { %v2937_v50 = vpop.f32.mrf.mxu1 }
 0xe19   : > { %v2960_v7 = vrot.slane %v2937_v50, %v4954_v30 }
 0xe1a   : > { %v4203_v42 = vpop.f32.mrf.mxu1 }
 0xe1c   : > { %v3127_v43 = vpop.f32.mrf.mxu1 }
 0xe1d   : > { %v3150_v9 = vrot.slane %v3127_v43, %v4954_v30 }
 0xe1e   : > { %v4213_v45 = vpop.f32.mrf.mxu1 }
 0xe1f   : > { %v2284_v46 = vpop.xlane.xlu0 %2283 }
 0xe20   : > { %v2286_v48 = vmul.f32 0.03125, %v2284_v46 }
 0xe22   : > { %v2288_v49 = vadd.f32 1e-05, %v2286_v48 }
 0xe24   : > { %4397 = vrsqrt.f32 %v2288_v49 }
 0xe31   : > { %v4398_v53 = vpop.eup %4397 }
 0xe32   : > { %v2292_v47 = vmul.f32 %v4398_v53, %v2276_v13 }
 0xe34   : > { %v2300_v57 = vmul.f32 %v4962_v37, %v2292_v47 }
 0xe36   : > { %v5059_v58 = vadd.f32 %v4970_v39, %v2300_v57 }
 0xe38   : > { %v3279_v62 = vadd.f32 %v3276_v56, %v5059_v58  ;;  %v3380_v20 = vsel %vm1095_vm1, %v5059_v58, 0.0 }
 0xe3a   : > { %v3295_v2 = vrot.slane %v3279_v62, 6 }
 0xe3c   : > { %v3296_v3 = vsel %vm3293_vm15, %v3294_v1, %v3295_v2 }
 0xe3d   : > { %4228 = vmatmul.mubr.msk.f32.vlgmr.msra.gmra.mxu1 %vm1091_vm0, %v3296_v3 }
 0xe54   : > { %v2766_v5 = vpop.xlane.xlu0 %2765 }
 0xe55   : > { %v2771_v6 = vadd.f32 %v2770_v4, %v2766_v5 }
 0xe57   : > { %v2773_v37 = vmul.f32 0.2, %v2771_v6  ;;  %vm2772_vm3 = vcmp.gt.f32.partialorder %v2771_v6, 0.0 }
 0xe58   : > { %v2956_v39 = vpop.xlane.xlu0 %2955 }
 0xe59   : > { %v2961_v8 = vadd.f32 %v2960_v7, %v2956_v39  ;;  %v2774_v10 = vsel %vm2772_vm3, %v2771_v6, %v2773_v37 }
 0xe5a   : > { %v2775_v11 = vsel %vm2581_vm12, %v2774_v10, -1e+09 }
 0xe5b   : > { %v2963_v12 = vmul.f32 0.2, %v2961_v8  ;;  %v2776_v55 = vsel %vm2583_vm14, %v2775_v11, -inf  ;;  %vm2962_vm7 = vcmp.gt.f32.partialorder %v2961_v8, 0.0 }
 0xe5c   : > { %v3146_v13 = vpop.xlane.xlu0 %3145  ;;  %2777 = vmax.xlane.f32.xlu0 %v2776_v55 }
 0xe5d   : > { %v3151_v51 = vadd.f32 %v3150_v9, %v3146_v13  ;;  %v2964_v14 = vsel %vm2962_vm7, %v2961_v8, %v2963_v12  ;;  %v3422_v13 = vld [vmem:[%s5259_s3 + $0x18] sm:$0xff] }
 0xe5e   : > { %v2965_v54 = vsel %vm2581_vm12, %v2964_v14, -1e+09  ;;  %v3958_v14 = vld [vmem:[%s5260_s16] ss:$0 sm:$0xff]  ;;  %s1053_s16 = sand.u32 1, %s4479_s1  }
 0xe5f   : > { %v3153_v15 = vmul.f32 0.2, %v3151_v51  ;;  %v2966_v16 = vsel %vm2583_vm14, %v2965_v54, -inf  ;;  %vm3152_vm8 = vcmp.gt.f32.partialorder %v3151_v51, 0.0 }
 0xe60   : > { %2967 = vmax.xlane.f32.xlu1 %v2966_v16  ;;  %v3959_v16 = vld [vmem:[%s5261_s4] ss:$0 sm:$0xff]  ;;  %s5263_s4 = sld [smem:[#allocation25_spill]] }
 0xe61   : > { %v3154_v17 = vsel %vm3152_vm8, %v3151_v51, %v3153_v15 }
 0xe62   : > { %v3155_v30 = vsel %vm2581_vm12, %v3154_v17, -1e+09  ;;  %v3421_v17 = vld [vmem:[%s5259_s3 + $0x10] sm:$0xff] }
 0xe63   : > { %v3156_v19 = vsel %vm2583_vm14, %v3155_v30, -inf }
 0xe64   : > { %3378 = vadd.xlane.f32.xlu1 %v3377_v18  ;;  %3157 = vmax.xlane.f32.xlu0 %v3156_v19  ;;  %v3420_v19 = vld [vmem:[%s5259_s3 + $0x8] sm:$0xff] }
 0xe68   : > { %3381 = vadd.xlane.f32.xlu0 %v3380_v20 }
 0xe9d   : > { %v2586_v21 = vpop.xlane.xlu0 %2585 }
 0xe9e   : > { %v2587_v44 = vsub.f32 %v2582_v38, %v2586_v21  ;;  %v3419_v21 = vld [vmem:[%s5259_s3] sm:$0xff]  ;;  %s1086_s3 = scalar_lea.vmem %s4697_s17, %s4965_s10  ;;  %s4433_s10 = scalar_lea.vmem %s4432_s12, 256 }
 0xea0   : > { %v2588_v22 = vmul.f32 1.442695, %v2587_v44 }
 0xea2   : > { %4399 = vpow2.f32 %v2588_v22  ;;  %v3580_v22 = vld [vmem:[%s5262_s5 + $0x78] sm:$0xff] }
 0xea3   : > { %4241 = vmatprep.subr.mxu1 %v3580_v22 }
 0xea4   : > { %4242 = vmatpush3.msra.mxu1 %v3580_v22 }
 0xeaf   : > { %v4400_v24 = vpop.eup %4399 }
 0xeb0   : > { %v2590_v0 = vsel %vm2583_vm14, %v4400_v24, 0.0 }
 0xeb1   : > { %2591 = vadd.xlane.f32.xlu1 %v2590_v0  ;;  %v3578_v0 = vld [vmem:[%s5262_s5 + $0x68] sm:$0xff] }
 0xee5   : > { %v2778_v25 = vpop.xlane.xlu0 %2777 }
 0xee6   : > { %v2779_v26 = vsub.f32 %v2775_v11, %v2778_v25  ;;  %v3577_v25 = vld [vmem:[%s5262_s5 + $0x60] sm:$0xff] }
 0xee8   : > { %v2780_v29 = vmul.f32 1.442695, %v2779_v26  ;;  %v3576_v26 = vld [vmem:[%s5262_s5 + $0x58] sm:$0xff] }
 0xee9   : > { %v2968_v31 = vpop.xlane.xlu1 %2967 }
 0xeea   : > { %4401 = vpow2.f32 %v2780_v29  ;;  %v2969_v32 = vsub.f32 %v2965_v54, %v2968_v31  ;;  %v3575_v29 = vld [vmem:[%s5262_s5 + $0x50] sm:$0xff]  ;;  %v3574_v31 = vld [vmem:[%s5262_s5 + $0x48] sm:$0xff] }
 0xeec   : > { %v2970_v33 = vmul.f32 1.442695, %v2969_v32 }
 0xeed   : > { %v3379_v34 = vpop.xlane.xlu1 %3378  ;;  %v3158_v35 = vpop.xlane.xlu0 %3157 }
 0xeee   : > { %4403 = vpow2.f32 %v2970_v33  ;;  %v3159_v36 = vsub.f32 %v3155_v30, %v3158_v35  ;;  %v3383_v27 = vmul.f32 0.03125, %v3379_v34  ;;  %v3573_v33 = vld [vmem:[%s5262_s5 + $0x40] sm:$0xff]  ;;  %v3572_v35 = vld [vmem:[%s5262_s5 + $0x38] sm:$0xff] }
 0xef0   : > { %v3160_v28 = vmul.f32 1.442695, %v3159_v36  ;;  %v3385_v40 = vsub.f32 %v4974_v41, %v3383_v27  ;;  %v3571_v36 = vld [vmem:[%s5262_s5 + $0x30] sm:$0xff]  ;;  %v3570_v27 = vld [vmem:[%s5262_s5 + $0x28] sm:$0xff] }
 0xef1   : > { %v3382_v38 = vpop.xlane.xlu0 %3381 }
 0xef2   : > { %4405 = vpow2.f32 %v3160_v28  ;;  %v3384_v50 = vmul.f32 0.03125, %v3382_v38  ;;  %v3387_v46 = vmul.f32 %v3385_v40, %v3385_v40  ;;  %v3569_v28 = vld [vmem:[%s5262_s5 + $0x20] sm:$0xff]  ;;  %v3568_v38 = vld [vmem:[%s5262_s5 + $0x18] sm:$0xff] }
 0xef4   : > { %v5080_v43 = vsub.f32 %v5059_v58, %v3384_v50  ;;  %v3389_v52 = vsel %vm1091_vm0, %v3387_v46, 0.0  ;;  %v3566_v50 = vld [vmem:[%s5262_s5 + $0x8] sm:$0xff] }
 0xef6   : > { %v3388_v53 = vmul.f32 %v5080_v43, %v5080_v43 }
 0xef7   : > { %v4402_v42 = vpop.eup %4401 }
 0xef8   : > { %v2782_v45 = vsel %vm2583_vm14, %v4402_v42, 0.0  ;;  %v3392_v62 = vsel %vm1095_vm1, %v3388_v53, 0.0  ;;  %v3960_v53 = vld [vmem:[%s5263_s4] ss:$0 sm:$0xff]  ;;  %s3879_s4 = sshll.u32 %s1053_s16, 3 }
 0xef9   : > { %2783 = vadd.xlane.f32.xlu0 %v2782_v45 }
 0xefb   : > { %v4404_v48 = vpop.eup %4403 }
 0xefc   : > { %v2972_v49 = vsel %vm2583_vm14, %v4404_v48, 0.0 }
 0xefd   : > { %2973 = vadd.xlane.f32.xlu1 %v2972_v49  ;;  %3390 = vadd.xlane.f32.xlu0 %v3389_v52  ;;  %v5087_v47 = vpop.f32.mrf.mxu1 }
 0xeff   : > { %v4406_v56 = vpop.eup %4405  ;;  %v4229_v57 = vpop.f32.mrf.mxu1 }
 0xf00   : > { %v3162_v61 = vsel %vm2583_vm14, %v4406_v56, 0.0 }
 0xf01   : > { %3163 = vadd.xlane.f32.xlu0 %v3162_v61  ;;  %3393 = vadd.xlane.f32.xlu1 %v3392_v62 }
 0xf3a   : > { %v2592_v1 = vpop.xlane.xlu1 %2591 }
 0xf3b   : > { %4407 = vrcp.f32 %v2592_v1 }
 0xf48   : > { %v4408_v2 = vpop.eup %4407 }
 0xf49   : > { %v2594_v3 = vmul.f32 %v4408_v2, %v4400_v24  ;;  %v3579_v24 = vld [vmem:[%s5262_s5 + $0x70] sm:$0xff] }
 0xf4a   : > { %4243 = vmatprep.subr.mxu1 %v3579_v24 }
 0xf4b   : > { %4187 = vmatmul.mubr.msk.f32.vlgmr.msra.gmra.mxu0 %vm2595_vm10, %v2594_v3  ;;  %4244 = vmatpush3.msra.mxu1 %v3579_v24 }
 0xf4c   : > { %4195 = vmatpush3.msk.msra.mxu0 %vm2599_vm9, %v5008_v60  ;;  %4196 = vmatprep.mubr.msk.f32.mxu0 %vm4532_vm6, %v4531_v23 }
 0xf4d   : > { %4204 = vmatprep.subr.mxu0 %v4531_v23  ;;  %4245 = vmatprep.subr.mxu1 %v3578_v0 }
 0xf4e   : > { %4246 = vmatpush3.msra.mxu1 %v3578_v0 }
 0xf4f   : > { %4247 = vmatprep.subr.mxu1 %v3577_v25 }
 0xf50   : > { %4248 = vmatpush3.msra.mxu1 %v3577_v25 }
 0xf51   : > { %4249 = vmatprep.subr.mxu1 %v3576_v26 }
 0xf52   : > { %4250 = vmatpush3.msra.mxu1 %v3576_v26 }
 0xf53   : > { %4251 = vmatprep.subr.mxu1 %v3575_v29 }
 0xf54   : > { %4252 = vmatpush3.msra.mxu1 %v3575_v29 }
 0xf55   : > { %4253 = vmatprep.subr.mxu1 %v3574_v31 }
 0xf56   : > { %4254 = vmatpush3.msra.mxu1 %v3574_v31 }
 0xf57   : > { %4255 = vmatprep.subr.mxu1 %v3573_v33 }
 0xf58   : > { %4256 = vmatpush3.msra.mxu1 %v3573_v33 }
 0xf59   : > { %4257 = vmatprep.subr.mxu1 %v3572_v35 }
 0xf5a   : > { %4258 = vmatpush3.msra.mxu1 %v3572_v35 }
 0xf5b   : > { %4259 = vmatprep.subr.mxu1 %v3571_v36 }
 0xf5c   : > { %4260 = vmatpush3.msra.mxu1 %v3571_v36 }
 0xf5d   : > { %4261 = vmatprep.subr.mxu1 %v3570_v27 }
 0xf5e   : > { %4262 = vmatpush3.msra.mxu1 %v3570_v27 }
 0xf5f   : > { %4263 = vmatprep.subr.mxu1 %v3569_v28 }
 0xf60   : > { %4264 = vmatpush3.msra.mxu1 %v3569_v28 }
 0xf61   : > { %4265 = vmatprep.subr.mxu1 %v3568_v38 }
 0xf62   : > { %4266 = vmatpush3.msra.mxu1 %v3568_v38 }
 0xf82   : > { %v2784_v4 = vpop.xlane.xlu0 %2783 }
 0xf83   : > { %4409 = vrcp.f32 %v2784_v4 }
 0xf86   : > { %v2974_v5 = vpop.xlane.xlu1 %2973  ;;  %v3391_v6 = vpop.xlane.xlu0 %3390 }
 0xf87   : > { %4411 = vrcp.f32 %v2974_v5  ;;  %v3395_v7 = vmul.f32 0.03125, %v3391_v6 }
 0xf89   : > { %v3397_v37 = vadd.f32 1e-05, %v3395_v7 }
 0xf8a   : > { %v3394_v39 = vpop.xlane.xlu1 %3393  ;;  %v3164_v8 = vpop.xlane.xlu0 %3163 }
 0xf8b   : > { %4413 = vrsqrt.f32 %v3397_v37  ;;  %v3396_v9 = vmul.f32 0.03125, %v3394_v39 }
 0xf8c   : > { %4415 = vrcp.f32 %v3164_v8 }
 0xf8d   : > { %v3398_v60 = vadd.f32 1e-05, %v3396_v9 }
 0xf8f   : > { %4417 = vrsqrt.f32 %v3398_v60 }
 0xf90   : > { %v4410_v10 = vpop.eup %4409 }
 0xf91   : > { %v2786_v11 = vmul.f32 %v4410_v10, %v4402_v42  ;;  %v3565_v42 = vld [vmem:[%s5262_s5] sm:$0xff] }
 0xf93   : > { %4197 = vmatmul.mubr.msk.f32.vlgmr.msra.gmra.mxu0 %vm2595_vm10, %v2786_v11 }
 0xf94   : > { %v4412_v12 = vpop.eup %4411  ;;  %4205 = vmatpush3.msk.msra.mxu0 %vm2599_vm9, %v5006_v59  ;;  %4206 = vmatprep.mubr.msk.f32.mxu0 %vm4532_vm6, %v4531_v23 }
 0xf95   : > { %4214 = vmatprep.subr.mxu0 %v4531_v23  ;;  %v2976_v55 = vmul.f32 %v4412_v12, %v4404_v48 }
 0xf97   : > { %4207 = vmatmul.mubr.msk.f32.vlgmr.msra.gmra.mxu0 %vm2595_vm10, %v2976_v55 }
 0xf98   : > { %v4414_v51 = vpop.eup %4413  ;;  %4215 = vmatpush3.msk.msra.mxu0 %vm2599_vm9, %v5014_v63  ;;  %4216 = vmatprep.mubr.msk.f32.mxu0 %vm4532_vm6, %v4531_v23 }
 0xf99   : > { %v4416_v54 = vpop.eup %4415  ;;  %4230 = vmatprep.subr.mxu0 %v3422_v13  ;;  %v3401_v59 = vmul.f32 %v4414_v51, %v3385_v40  ;;  %v3567_v40 = vld [vmem:[%s5262_s5 + $0x10] sm:$0xff] }
 0xf9a   : > { %v3166_v15 = vmul.f32 %v4416_v54, %v4406_v56  ;;  %4267 = vmatprep.subr.mxu1 %v3567_v40 }
 0xf9b   : > { %v3409_v30 = vmul.f32 %v3958_v14, %v3401_v59  ;;  %4268 = vmatpush3.msra.mxu1 %v3567_v40 }
 0xf9c   : > { %v4418_v18 = vpop.eup %4417  ;;  %4217 = vmatmul.mubr.msk.f32.vlgmr.msra.gmra.mxu0 %vm2595_vm10, %v3166_v15  ;;  %4269 = vmatprep.subr.mxu1 %v3566_v50 }
 0xf9d   : > { %4231 = vmatpush3.msra.mxu0 %v3422_v13  ;;  %v3402_v63 = vmul.f32 %v4418_v18, %v5080_v43  ;;  %v3417_v20 = vadd.f32 %v3959_v16, %v3409_v30  ;;  %4270 = vmatpush3.msra.mxu1 %v3566_v50 }
 0xf9e   : > { %4232 = vmatprep.subr.mxu0 %v3421_v17  ;;  %4271 = vmatprep.subr.mxu1 %v3565_v42 }
 0xf9f   : > { %4233 = vmatpush3.msra.mxu0 %v3421_v17  ;;  %v3410_v23 = vmul.f32 %v3958_v14, %v3402_v63  ;;  %4238 = vmatprep.mubr.msk.f32.mxu0 %vm1091_vm0, %v3417_v20 }
 0xfa0   : > { %4234 = vmatprep.subr.mxu0 %v3420_v19  ;;  %4272 = vmatpush3.msra.mxu1 %v3565_v42 }
 0xfa1   : > { %v3418_v44 = vadd.f32 %v3959_v16, %v3410_v23  ;;  %4235 = vmatpush3.msra.mxu0 %v3420_v19 }
 0xfa2   : > { %4236 = vmatprep.subr.mxu0 %v3419_v21 }
 0xfa3   : > { %4237 = vmatpush3.msra.mxu0 %v3419_v21 }
 0xfa4   : > { %4239 = vmatmul.mubr.msk.f32.vlgmr.msra.gmra.mxu0 %vm1091_vm0, %v3418_v44 }
0x100b   : > { %v5125_v32 = vpop.f32.mrf.mxu0 }
0x100d   : > { %v4188_v34 = vpop.f32.mrf.mxu0 }
0x1053   : > { %v2858_v43 = vpop.f32.mrf.mxu0 }
0x1054   : > { %3243 = vrot.lane.b32.xlu1 %v2858_v43, %s5253_s15  ;;  %s5266_s15 = sld [smem:[#allocation18_spill]] }
0x1055   : > { %v4198_v45 = vpop.f32.mrf.mxu0 }
0x1057   : > { %v3048_v46 = vpop.f32.mrf.mxu0 }
0x1058   : > { %3247 = vrot.lane.b32.xlu0 %v3048_v46, %s5256_s8  ;;  %s5264_s8 = sld [smem:[#allocation20_spill]] }
0x1059   : > { %v4208_v48 = vpop.f32.mrf.mxu0 }
0x105c   : > { %v3238_v49 = vpop.f32.mrf.mxu0 }
0x105d   : > { %3251 = vrot.lane.b32.xlu1 %v3238_v49, %s5255_s6  ;;  %s5265_s6 = sld [smem:[#allocation21_spill]] }
0x105e   : > { %v4218_v52 = vpop.f32.mrf.mxu0  ;;  %v3956_v46 = vld [vmem:[%s5264_s8] ss:$0 sm:$0xff]  ;;  %s3966_s8 = sshll.u32 %s4725_s0, 7  ;;  %s3684_s0 = scalar_lea.sflag [#allocation3], %s1053_s16 }
0x105f   : > { %v3366_v49 = vadd.f32 %v3956_v46, %v5087_v47  ;;  %s5159_s5 = scalar_lea.hbm %s4702_s27, %s3966_s8 }
0x1064   : > { %v4240_v56 = vpop.f32.mrf.mxu0 }
0x1065   : > { %v3508_v57 = vadd.f32 %v4240_v56, %v3960_v53 }
0x1066   : > { %v3502_v61 = vpop.f32.mrf.mxu0 }
0x1067   : > { %v3514_v62 = vmul.f32 0.70710677, %v3508_v57  ;;  %v3503_v1 = vadd.f32 %v3960_v53, %v3502_v61  ;;  %v3512_v50 = vmul.f32 0.5, %v3508_v57  ;;  %v3955_v53 = vld [vmem:[%s5265_s6] ss:$0 sm:$0xff]  ;;  %s1055_s6 = scalar_lea.vmem [#allocation2], %s3879_s4 }
0x1068   : > { %v3954_v57 = vld [vmem:[%s5266_s15] ss:$0 sm:$0xff]  ;;  %s3700_s15 = sshll.u32 %s1055_s6, 4  ;;  %s3701_s15 = int_to_ptr.vmem [resolvable:$true] %s3700_s15 }
0x1069   : > { %v3516_v2 = vand.u32 2147483647, %v3514_v62  ;;  %v3513_v3 = vmul.f32 0.70710677, %v3503_v1  ;;  %vm3556_vm0 = vcmp.ge.f32.partialorder %v3514_v62, 0.0  ;;  %v3511_v38 = vmul.f32 0.5, %v3503_v1  ;;  %p4434_p0 = scmp.lt.s32.totalorder %s3701_s15, %s4432_s12 }
0x106a   : > { %v3369_v1 = vmul.f32 %v3955_v53, %v3366_v49  ;;  %s4427_s4 = scalar_lea.vmem %s3701_s15, 128 }
0x106b   : > { %v3518_v4 = vmul.f32 0.3275911, %v3516_v2  ;;  %v3515_v5 = vand.u32 2147483647, %v3513_v3  ;;  %v3544_v39 = vsub.f32 0.0, %v3516_v2  ;;  %vm3555_vm6 = vcmp.ge.f32.partialorder %v3513_v3, 0.0  ;;  %p4428_p11 = scmp.ne.s32.totalorder %s3701_s15, %s4427_s4  ;;  %p4435_p1 = scmp.lt.s32.totalorder %s4433_s10, %s4427_s4 }
0x106c   : > { %v3963_v3 = vld [vmem:[%s4687_s20] ss:$0 sm:$0xff] }
0x106d   : > { %v3520_v6 = vadd.f32 1.0, %v3518_v4  ;;  %v3517_v7 = vmul.f32 0.3275911, %v3515_v5  ;;  %v3543_v8 = vsub.f32 0.0, %v3515_v5  ;;  %v3546_v9 = vmul.f32 %v3544_v39, %v3516_v2  ;;  %p4429_p12 = pnand %p4428_p11, %p4742_p5  ;;  %p4436_p2 = por %p4435_p1, %p4434_p0 }
0x106e   : > { %v3371_v4 = vrot.slane %v3369_v1, 2 }
0x106f   : > { %4419 = vrcp.f32 %v3520_v6  ;;  %v3519_v37 = vadd.f32 1.0, %v3517_v7  ;;  %v3545_v10 = vmul.f32 %v3543_v8, %v3515_v5  ;;  %v3549_v12 = vmul.f32 1.442695, %v3546_v9  ;;  %v3964_v5 = vld [vmem:[%s4692_s21] ss:$0 sm:$0xff]  ;;  %p4430_p13 = pneg %p4429_p12 }
0x1070   : > { %v3373_v9 = vadd.f32 %v3371_v4, %v4974_v41 }
0x1071   : > { %4421 = vrcp.f32 %v3519_v37  ;;  %v3547_v51 = vmul.f32 1.442695, %v3545_v10  ;;  %p4437_p3 = pnand %p4436_p2, %p4430_p13 }
0x1072   : > { %4423 = vpow2.f32 %v3549_v12 }
0x1073   : > { %4425 = vpow2.f32 %v3547_v51 }
0x107c   : > { %v4420_v60 = vpop.eup %4419 }
0x107d   : > { %v3526_v11 = vmul.f32 1.0614054, %v4420_v60 }
0x107e   : > { %v4422_v55 = vpop.eup %4421 }
0x107f   : > { %v3528_v13 = vadd.f32 -1.4531521, %v3526_v11  ;;  %v3525_v14 = vmul.f32 1.0614054, %v4422_v55  ;;  %v4424_v22 = vpop.eup %4423 }
0x1080   : > { %v4426_v26 = vpop.eup %4425 }
0x1081   : > { %v3530_v54 = vmul.f32 %v4420_v60, %v3528_v13  ;;  %v3527_v59 = vadd.f32 -1.4531521, %v3525_v14 }
0x1083   : > { %v3532_v15 = vadd.f32 1.4214138, %v3530_v54  ;;  %v3529_v16 = vmul.f32 %v4422_v55, %v3527_v59 }
0x1085   : > { %v3534_v17 = vmul.f32 %v4420_v60, %v3532_v15  ;;  %v3531_v30 = vadd.f32 1.4214138, %v3529_v16 }
0x1087   : > { %v3536_v18 = vadd.f32 -0.28449672, %v3534_v17  ;;  %v3533_v19 = vmul.f32 %v4422_v55, %v3531_v30 }
0x1089   : > { %v3538_v63 = vmul.f32 %v4420_v60, %v3536_v18  ;;  %v3535_v20 = vadd.f32 -0.28449672, %v3533_v19 }
0x108b   : > { %v3540_v23 = vadd.f32 0.2548296, %v3538_v63  ;;  %v3537_v21 = vmul.f32 %v4422_v55, %v3535_v20 }
0x108d   : > { %v3542_v44 = vmul.f32 %v4420_v60, %v3540_v23  ;;  %v3539_v24 = vadd.f32 0.2548296, %v3537_v21 }
0x108f   : > { %v3552_v0 = vmul.f32 %v4424_v22, %v3542_v44  ;;  %v3541_v25 = vmul.f32 %v4422_v55, %v3539_v24 }
0x1091   : > { %v3554_v29 = vsub.f32 1.0, %v3552_v0  ;;  %v3551_v31 = vmul.f32 %v4426_v26, %v3541_v25 }
0x1093   : > { %v3558_v33 = vsub.f32 0.0, %v3554_v29  ;;  %v3553_v34 = vsub.f32 1.0, %v3551_v31 }
0x1095   : > { %v3560_v35 = vsel %vm3556_vm0, %v3554_v29, %v3558_v33  ;;  %v3557_v36 = vsub.f32 0.0, %v3553_v34 }
0x1096   : > { %v3562_v27 = vadd.f32 1.0, %v3560_v35 }
0x1097   : > { %v3559_v28 = vsel %vm3555_vm6, %v3553_v34, %v3557_v36 }
0x1098   : > { %v3561_v40 = vadd.f32 1.0, %v3559_v28  ;;  %v3564_v43 = vmul.f32 %v3562_v27, %v3512_v50 }
0x109a   : > { %v3563_v42 = vmul.f32 %v3561_v40, %v3511_v38 }
0x109c   : > { %4273 = vmatprep.mubr.f32.mxu1 %v3563_v42 }
0x109d   : > { %4274 = vmatmul.mubr.f32.vlgmr.msra.gmra.mxu1 %v3564_v43 }
0x10c6   : > { %v3244_v45 = vpop.permute.xlu1 %3243 }
0x10c7   : > { %v3254_v56 = vsel %vm1332_vm2, %v5125_v32, %v3244_v45  ;;  %v3374_v32 = vadd.f32 %v3371_v4, %v5059_v58  ;;  %vm3676_vm2 = vcmask 261126  }
0x10ca   : > { %v3248_v48 = vpop.permute.xlu0 %3247 }
0x10cb   : > { %v3255_v61 = vsel %vm1420_vm4, %v3254_v56, %v3248_v48 }
0x10cf   : > { %v3252_v52 = vpop.permute.xlu1 %3251 }
0x10d0   : > { %v3256_v62 = vsel %vm2159_vm5, %v3255_v61, %v3252_v52 }
0x10d1   : > { %v3264_v2 = vadd.f32 %v3954_v57, %v3256_v62 }
0x10d3   : > { %v3272_v6 = vmul.f32 %v3955_v53, %v3264_v2 }
0x10d5   : > { %v3273_v10 = vadd.f32 %v3272_v6, %v4974_v41 }
0x115d   : > { %v4275_v47 = vpop.f32.mrf.mxu1 }
0x115e   : > { %v3660_v7 = vadd.f32 %v4275_v47, %v3963_v3 }
0x115f   : > { %v3654_v37 = vpop.f32.mrf.mxu1 }
0x1160   : > { %v3673_v39 = vmul.f32 %v3964_v5, %v3660_v7  ;;  %v3655_v8 = vadd.f32 %v3963_v3, %v3654_v37 }
0x1162   : > { %v3675_v60 = vadd.f32 %v3673_v39, %v3374_v32  ;;  %v3670_v11 = vmul.f32 %v3964_v5, %v3655_v8 }
0x1164   : > { %v3671_v12 = vadd.f32 %v3670_v11, %v3273_v10  ;;  %v3674_v55 = vadd.f32 %v3670_v11, %v3373_v9  ;;  %3678 = vst.msk [vmem:[%s1055_s6 + $0x2] sm:$0x3f] %vm1095_vm1, %v3675_v60 }
0x1166   : > { %3672 = vst.msk [vmem:[%s1086_s3] sm:$0x3f] %vm1095_vm1, %v3671_v12 }
0x1167   : > { %3677 = vst.msk [vmem:[%s1055_s6 - $0x6] sm:$0xc0] %vm3676_vm2, %v3674_v55 }
0x1168   : > { %4440 = shalt.err (!%p4437_p3)
}
0x1169   : > { %s4441_s3 = scalar_lea.hbm %s5159_s5, 128  ;;  %s4445_s16 = scalar_lea.hbm %s4702_s27, 256 }
0x116a   : > { %p4442_p4 = scmp.ne.s32.totalorder %s5159_s5, %s4441_s3  ;;  %p4446_p9 = scmp.lt.s32.totalorder %s5159_s5, %s4702_s27 }
0x116b   : > { %p4447_p10 = scmp.lt.s32.totalorder %s4445_s16, %s4441_s3 }
0x116c   : > { %p4443_p7 = pnand %p4442_p4, %p4742_p5 }
0x116d   : > { %p4448_p11 = por %p4447_p10, %p4446_p9 }
0x116e   : > { %p4444_p8 = pneg %p4443_p7 }
0x1170   : > { %p4449_p12 = pnand %p4448_p11, %p4444_p8 }
0x1172   : > { %4452 = shalt.err (!%p4449_p12)
}
0x1173   : > { %4276 = dma.vmem_to_hbm [thread:$0]  (%p4742_p5), %s3701_s15, 128, %s5159_s5, %s3684_s0  }
0x1174 PF: > { %p4282_p13 = scmp.ge.s32.totalorder %s4487_s7, 2  ;;  %s3719_s9 = sand.u32 1, %s4475_s28  }
0x1175   : > { %s3720_s12 = scalar_lea.sflag [#allocation3], %s3719_s9 }
0x1176   : > { %p4279_p0 = pnand %p4282_p13, %p4746_p6 }
0x1178   : > { %p4280_p1 = pneg %p4279_p0 }
0x117a   : > { %4470 = dma.done.wait (%p4280_p1), %s3720_s12, 128  }
0x117b   : > { %4472 = vsyncadd (%p4280_p1), %s3720_s12, 4294967168  ;;  %p76_p2 = scmp.ge.s32.totalorder %s4729_s11, 4   ;;  %s5267_s28 = smov %s4479_s1 }
0x117c   : > { %s5268_s1 = smov %s4483_s2  ;;  %s5269_s2 = smov %s4740_s18 }
0x117d   : > { %s5270_s7 = smov %s4729_s11  ;;  %78 = sbr.rel (!%p76_p2) target bundleno = 65 (0x41), region = 238 }
0x1182   :  { %3725 = vsyncpa [#allocation3], 1 }
0x1183   :  { %3727 = vsyncpa [#allocation3 + $0x1], 1 }

</bundles_post_ra>
